<compile_context>
chip_gen: v7x
topology: tpu7x:2x2x1
jax: 0.10.0
libtpu: 0.0.40
codegen_flags: <defaults>
</compile_context>

<pallas_src>
import math
import numpy as np
import jax
import jax.numpy as jnp
from jax import lax
from jax.experimental import pallas as pl
from jax.experimental.pallas import tpu as pltpu

BN_EPS = 1e-3
BN_SCALE = float(1.0 / np.sqrt(1.0 + BN_EPS))  # eval-mode BN, no affine


def _round_up(x, m):
    return (x + m - 1) // m * m


def _lane_pad_cin(cin, nsample):
    """Pad the per-point channel count so the (G, nsample*cin_pad) slab is
    lane-dense (nsample*cin_pad a multiple of 128 when cheap)."""
    q = 128 // math.gcd(nsample, 128)
    p = _round_up(cin, q)
    if p > 4 * _round_up(cin, 8):        # guard pathological nsample values
        p = _round_up(cin, 8)
    return p


def _g_tile_target_for_device():
    """Per-generation group-tile target: v5e/v6e have 128 MiB VMEM (bigger
    tiles amortize per-step overhead); v7x has only 64 MiB per TensorCore."""
    try:
        kind = jax.devices()[0].device_kind.lower()
    except Exception:
        return 512
    if "v7" in kind or "7x" in kind:
        return 256
    if "v5" in kind or "v6" in kind:
        return 1024
    return 512


# ----------------------------------------------------------------------------
# Fused Pallas kernel: per-scale block-diag MLP + nsample max-pool + concat +
# aggregation Conv1d(+BN folded)+ReLU, all in one pallas_call.
# ----------------------------------------------------------------------------
def _make_fused_kernel(scale_meta):
    """scale_meta: static tuple of (n_layers, nsample, c_last) per scale."""

    def kernel(*refs):
        o_ref = refs[-1]
        in_refs = refs[:-1]
        p = 0
        pooled = []
        for n_layers, S, c_last in scale_meta:
            h = in_refs[p][...]                          # (g_tile, S*cin_pad) bf16
            p += 1
            for _ in range(n_layers):
                w = in_refs[p][...]                      # (S*k, S*c) bf16, block-diag
                b = in_refs[p + 1][...]                  # (1, S*c)   f32
                p += 2
                acc = jnp.dot(h, w, preferred_element_type=jnp.float32)
                h = jnp.maximum(acc + b, 0.0).astype(jnp.bfloat16)
            # Max-pool over the nsample blocks; lane layout is [s0 c0..c-1|s1 ...].
            width = h.shape[-1]
            if S & (S - 1) == 0:
                # log2(S) halving folds: VALU max over static lane slices,
                # no 3-D reshape, no sublane reduction.
                while width > c_last:
                    half = width // 2
                    h = jnp.maximum(h[:, :half], h[:, half:width])
                    width = half
                pooled.append(h)                         # (g_tile, c_last) bf16
            else:
                acc_p = h[:, :c_last]
                for s in range(1, S):
                    acc_p = jnp.maximum(acc_p, h[:, s * c_last:(s + 1) * c_last])
                pooled.append(acc_p)
        concat = jnp.concatenate(pooled, axis=-1)        # (g_tile, sum c_last) bf16
        agg_w = in_refs[p][...]                          # (sum c_last, 128) bf16
        agg_b = in_refs[p + 1][...]                      # (1, 128) f32
        out = jnp.dot(concat, agg_w, preferred_element_type=jnp.float32) + agg_b
        o_ref[...] = jnp.maximum(out, 0.0).astype(o_ref.dtype)

    return kernel


def fused_msg_mlp_agg(grouped_flats, scale_params, scale_meta,
                      agg_w_pad, agg_b_pad, G, *, g_tile_target=None):
    """grouped_flats[i]: (G, S_i*cin_pad_i) bf16 lane-dense slab.
    scale_params[i]: list of (block-diag W bf16, tiled bias f32), BN folded.
    Returns (G, agg_cout_pad) bf16."""
    if g_tile_target is None:
        g_tile_target = _g_tile_target_for_device()
    # Tile multiple of 16 (bf16 sublane packing); keep several grid steps so
    # double-buffering / megacore sharding have work to overlap.
    g_tile = min(g_tile_target, _round_up(max((G + 7) // 8, 16), 16))
    G_pad = _round_up(G, g_tile)
    agg_cout_pad = agg_w_pad.shape[1]

    args = []
    in_specs = []
    for x, layers in zip(grouped_flats, scale_params):
        lanes = x.shape[1]
        if G_pad > G:
            x = jnp.pad(x, ((0, G_pad - G), (0, 0)))
        args.append(x)
        in_specs.append(pl.BlockSpec((g_tile, lanes), lambda i: (i, 0)))
        for w, b in layers:
            args += [w, b]
            # TODO(synk): these are grid-invariant; pipeline_mode=pl.Buffered(1)
            # (or a one-time DMA into scratch) would drop their second buffer.
            in_specs.append(pl.BlockSpec(w.shape, lambda i: (0, 0)))
            in_specs.append(pl.BlockSpec(b.shape, lambda i: (0, 0)))
    args += [agg_w_pad, agg_b_pad]
    in_specs.append(pl.BlockSpec(agg_w_pad.shape, lambda i: (0, 0)))
    in_specs.append(pl.BlockSpec(agg_b_pad.shape, lambda i: (0, 0)))

    out = pl.pallas_call(
        _make_fused_kernel(tuple(scale_meta)),
        out_shape=jax.ShapeDtypeStruct((G_pad, agg_cout_pad), jnp.bfloat16),
        grid_spec=pltpu.PrefetchScalarGridSpec(
            num_scalar_prefetch=0,
            grid=(G_pad // g_tile,),
            in_specs=in_specs,
            out_specs=pl.BlockSpec((g_tile, agg_cout_pad), lambda i: (i, 0)),
        ),
        compiler_params=pltpu.CompilerParams(
            dimension_semantics=("parallel",),
            vmem_limit_bytes=48 * 1024 * 1024),
    )(*args)
    return out[:G]


# ----------------------------------------------------------------------------
# Parameter preparation: fold eval-mode BN (relu(xW+b)*s == relu(x(Ws)+bs),
# s>0), pad the input channel dim, expand each per-point conv into a
# block-diagonal kron(I_S, W) weight over nsample, cast matmul operands to bf16.
# ----------------------------------------------------------------------------
def prepare_params(params, agg_params, nsample_list, cin, agg_cout_pad):
    scale_params = []
    scale_meta = []
    cin_pads = []
    for layers, S in zip(params, nsample_list):
        cin_pad = _lane_pad_cin(cin, S)
        cin_pads.append(cin_pad)
        in_dim = cin_pad
        prepped = []
        for w, b in layers:
            k, c = w.shape
            wf = w * BN_SCALE
            bf = b * BN_SCALE
            wp = jnp.zeros((in_dim, c), jnp.float32).at[:k, :].set(wf)
            wbd = jnp.kron(jnp.eye(S, dtype=jnp.float32), wp).astype(jnp.bfloat16)
            btl = jnp.tile(bf, (1, S)).astype(jnp.float32)
            prepped.append((wbd, btl))
            in_dim = c
        scale_params.append(prepped)
        scale_meta.append((len(layers), S, in_dim))
    agg_w, agg_b = agg_params
    agg_out = agg_w.shape[1]
    agg_w_p = jnp.zeros((agg_w.shape[0], agg_cout_pad), jnp.float32
                        ).at[:, :agg_out].set(agg_w * BN_SCALE).astype(jnp.bfloat16)
    agg_b_p = jnp.zeros((1, agg_cout_pad), jnp.float32
                        ).at[:, :agg_out].set(agg_b * BN_SCALE)
    return scale_params, scale_meta, cin_pads, agg_w_p, agg_b_p


# Pure-JAX (XLA) computation of the identical math — used as the reference.
def reference_msg_mlp_agg(grouped_flats, scale_params, scale_meta,
                          agg_w_pad, agg_b_pad, G):
    pooled = []
    for x, layers, (n_layers, S, c_last) in zip(grouped_flats, scale_params,
                                                scale_meta):
        h = x
        for w, b in layers:
            h = jnp.maximum(jnp.dot(h, w, preferred_element_type=jnp.float32) + b,
                            0.0).astype(jnp.bfloat16)
        h3 = h.astype(jnp.float32).reshape(G, S, c_last)
        pooled.append(jnp.max(h3, axis=1).astype(jnp.bfloat16))
    concat = jnp.concatenate(pooled, axis=-1)
    out = jnp.dot(concat, agg_w_pad, preferred_element_type=jnp.float32) + agg_b_pad
    return jnp.maximum(out, 0.0)


# ----------------------------------------------------------------------------
# Plain-JAX glue: FPS, ball query, grouping (data-dependent gather)
# ----------------------------------------------------------------------------
def farthest_point_sample(xyz, npoint):
    """D-FPS, seeded at index 0 (pointnet2 convention). xyz: (B,N,3)."""
    B, N, _ = xyz.shape

    def body(i, carry):
        idxs, dists, farthest = carry
        idxs = idxs.at[:, i].set(farthest)
        centroid = xyz[jnp.arange(B), farthest][:, None, :]        # (B,1,3)
        d = jnp.sum((xyz - centroid) ** 2, axis=-1)                # (B,N)
        dists = jnp.minimum(dists, d)
        farthest = jnp.argmax(dists, axis=-1).astype(jnp.int32)
        return idxs, dists, farthest

    init = (jnp.zeros((B, npoint), jnp.int32),
            jnp.full((B, N), 1e10, jnp.float32),
            jnp.zeros((B,), jnp.int32))
    idxs, _, _ = lax.fori_loop(0, npoint, body, init)
    return idxs


def ball_query(radius, nsample, xyz, new_xyz):
    """pointnet2-style ball query: first nsample points with d^2 < r^2,
    empty slots filled with the first hit (0 if none)."""
    # TODO(synk): degenerate "no neighbor in radius" case approximates the
    # reference CUDA op (fills with index 0).
    B, N, _ = xyz.shape
    d2 = jnp.sum((new_xyz[:, :, None, :] - xyz[:, None, :, :]) ** 2, axis=-1)
    within = d2 < radius * radius
    cand = jnp.where(within, jnp.arange(N, dtype=jnp.int32)[None, None, :], N)
    cand = jnp.sort(cand, axis=-1)[..., :nsample]
    first = cand[..., :1]
    idx = jnp.where(cand >= N, first, cand)
    idx = jnp.where(idx >= N, 0, idx)
    return idx.astype(jnp.int32)


def group_points(xyz, points, new_xyz, idx):
    """Gather neighbors, recenter xyz, concat features -> (B, M, nsample, 3+C)."""
    B = xyz.shape[0]
    bidx = jnp.arange(B)[:, None, None]
    grouped_xyz = xyz[bidx, idx] - new_xyz[:, :, None, :]      # (B,M,S,3)
    grouped_pts = points[bidx, idx]                            # (B,M,S,C)
    return jnp.concatenate([grouped_xyz, grouped_pts], axis=-1)


# ----------------------------------------------------------------------------
# Module forward (former_fps_idx=None, vote_ctr=None, dilated_group=False,
# single D-FPS range covering all points)
# ----------------------------------------------------------------------------
def pointnet_sa_module_msg(xyz, points, params, agg_params,
                           npoint, radius_list, nsample_list,
                           use_pallas=True, g_tile_target=None):
    B, N, _ = xyz.shape
    M = npoint
    G = B * M
    C = points.shape[-1]
    cin = 3 + C

    fps_idx = farthest_point_sample(xyz, npoint)                     # (B,M)
    new_xyz = xyz[jnp.arange(B)[:, None], fps_idx]                   # (B,M,3)

    agg_out = agg_params[0].shape[1]
    agg_cout_pad = _round_up(agg_out, 128)
    scale_params, scale_meta, cin_pads, agg_w_p, agg_b_p = prepare_params(
        params, agg_params, nsample_list, cin, agg_cout_pad)

    grouped_flats = []
    for radius, S, cin_pad in zip(radius_list, nsample_list, cin_pads):
        idx = ball_query(radius, S, xyz, new_xyz)                    # (B,M,S)
        grouped = group_points(xyz, points, new_xyz, idx)            # (B,M,S,cin)
        if cin_pad > cin:
            grouped = jnp.pad(grouped,
                              ((0, 0), (0, 0), (0, 0), (0, cin_pad - cin)))
        # Lane-dense slab: one group per row, the S samples laid out along lanes.
        x = grouped.reshape(G, S * cin_pad).astype(jnp.bfloat16)
        grouped_flats.append(x)

    if use_pallas:
        out = fused_msg_mlp_agg(grouped_flats, scale_params, scale_meta,
                                agg_w_p, agg_b_p, G,
                                g_tile_target=g_tile_target)         # (G,128) bf16
    else:
        # TODO(synk): this reference validates Pallas-vs-XLA of identical
        # (bf16-matmul, BN-folded) math, not fp32 fidelity to the PyTorch module.
        out = reference_msg_mlp_agg(grouped_flats, scale_params, scale_meta,
                                    agg_w_p, agg_b_p, G)             # (G,128) f32

    new_points = out[:, :agg_out].astype(jnp.float32).reshape(B, M, agg_out)
    return new_xyz, new_points, fps_idx


# ----------------------------------------------------------------------------
# Deterministic parameter init (pt_utils.Conv2d / Conv1d weight + bias)
# ----------------------------------------------------------------------------
def init_params(key, mlp_dims_list, agg_in, agg_out):
    params = []
    for dims in mlp_dims_list:
        layers = []
        for cin, cout in zip(dims[:-1], dims[1:]):
            key, kw, kb = jax.random.split(key, 3)
            w = jax.random.normal(kw, (cin, cout), jnp.float32) / np.sqrt(cin)
            b = 0.01 * jax.random.normal(kb, (1, cout), jnp.float32)
            layers.append((w, b))
        params.append(layers)
    key, kw, kb = jax.random.split(key, 3)
    agg_w = jax.random.normal(kw, (agg_in, agg_out), jnp.float32) / np.sqrt(agg_in)
    agg_b = 0.01 * jax.random.normal(kb, (1, agg_out), jnp.float32)
    return params, (agg_w, agg_b)


if __name__ == "__main__":
    # Small config consistent with the module:
    #   xyz (B, N, 3), points (B, N, C); npoint=32,
    #   radius_list=[0.25, 0.5], nsample_list=[8, 16],
    #   mlp_list=[[16,32],[32,64]]  (pre_channel=C=4 -> [7,16,32],[7,32,64]),
    #   aggregation_channel=64.
    B, N, C = 2, 64, 4
    NPOINT = 32
    RADIUS_LIST = [0.25, 0.5]
    NSAMPLE_LIST = [8, 16]
    MLP_LIST = [[16, 32], [32, 64]]
    AGG_CHANNEL = 64

    mlp_dims_list = [[C + 3] + m for m in MLP_LIST]
    agg_in = sum(m[-1] for m in MLP_LIST)

    key = jax.random.PRNGKey(0)
    kx, kp, kw = jax.random.split(key, 3)
    xyz = jax.random.uniform(kx, (B, N, 3), jnp.float32)
    points = jax.random.normal(kp, (B, N, C), jnp.float32)

    params, agg_params = init_params(kw, mlp_dims_list, agg_in, AGG_CHANNEL)

    new_xyz, new_points, fps_idx = pointnet_sa_module_msg(
        xyz, points, params, agg_params,
        NPOINT, RADIUS_LIST, NSAMPLE_LIST, use_pallas=True)
    jax.block_until_ready((new_xyz, new_points, fps_idx))

    # Pure-JAX (XLA) reference of the same math (sanity check of the Pallas path).
    _, ref_points, _ = pointnet_sa_module_msg(
        xyz, points, params, agg_params,
        NPOINT, RADIUS_LIST, NSAMPLE_LIST, use_pallas=False)
    jax.block_until_ready(ref_points)

    assert new_xyz.shape == (B, NPOINT, 3)
    assert new_points.shape == (B, NPOINT, AGG_CHANNEL)
    assert fps_idx.shape == (B, NPOINT)
    np.testing.assert_allclose(np.asarray(new_points), np.asarray(ref_points),
                               rtol=2e-2, atol=2e-2)
    print("KERNEL_OK")
</pallas_src>

<mosaic_0001>
module attributes {stable_mosaic.version = 11 : i64} {
  func.func @kernel(%arg0: i32, %arg1: memref<16x128xbf16, #tpu.memory_space<vmem>>, %arg2: memref<128x128xbf16, #tpu.memory_space<vmem>>, %arg3: memref<1x128xf32, #tpu.memory_space<vmem>>, %arg4: memref<128x256xbf16, #tpu.memory_space<vmem>>, %arg5: memref<1x256xf32, #tpu.memory_space<vmem>>, %arg6: memref<16x128xbf16, #tpu.memory_space<vmem>>, %arg7: memref<128x512xbf16, #tpu.memory_space<vmem>>, %arg8: memref<1x512xf32, #tpu.memory_space<vmem>>, %arg9: memref<512x1024xbf16, #tpu.memory_space<vmem>>, %arg10: memref<1x1024xf32, #tpu.memory_space<vmem>>, %arg11: memref<96x128xbf16, #tpu.memory_space<vmem>>, %arg12: memref<1x128xf32, #tpu.memory_space<vmem>>, %arg13: memref<16x128xbf16, #tpu.memory_space<vmem>>) attributes {dimension_semantics = [#tpu.dimension_semantics<parallel>], iteration_bounds = array<i64: 4>, scalar_prefetch = 0 : i64, scratch_operands = 0 : i64, tpu.core_type = #tpu.core_type<tc>, window_params = [{transform_indices = @transform_0, window_bounds = array<i64: 16, 128>}, {pipeline_mode = #tpu.pipeline_mode<synchronous>, transform_indices = @transform_1, window_bounds = array<i64: 128, 128>}, {pipeline_mode = #tpu.pipeline_mode<synchronous>, transform_indices = @transform_2, window_bounds = array<i64: 1, 128>}, {pipeline_mode = #tpu.pipeline_mode<synchronous>, transform_indices = @transform_3, window_bounds = array<i64: 128, 256>}, {pipeline_mode = #tpu.pipeline_mode<synchronous>, transform_indices = @transform_4, window_bounds = array<i64: 1, 256>}, {transform_indices = @transform_5, window_bounds = array<i64: 16, 128>}, {pipeline_mode = #tpu.pipeline_mode<synchronous>, transform_indices = @transform_6, window_bounds = array<i64: 128, 512>}, {pipeline_mode = #tpu.pipeline_mode<synchronous>, transform_indices = @transform_7, window_bounds = array<i64: 1, 512>}, {pipeline_mode = #tpu.pipeline_mode<synchronous>, transform_indices = @transform_8, window_bounds = array<i64: 512, 1024>}, {pipeline_mode = #tpu.pipeline_mode<synchronous>, transform_indices = @transform_9, window_bounds = array<i64: 1, 1024>}, {pipeline_mode = #tpu.pipeline_mode<synchronous>, transform_indices = @transform_10, window_bounds = array<i64: 96, 128>}, {pipeline_mode = #tpu.pipeline_mode<synchronous>, transform_indices = @transform_11, window_bounds = array<i64: 1, 128>}, {transform_indices = @transform_12, window_bounds = array<i64: 16, 128>}]} {
    %c0 = arith.constant 0 : index
    %c0_0 = arith.constant 0 : index
    %0 = vector.load %arg1[%c0, %c0_0] : memref<16x128xbf16, #tpu.memory_space<vmem>>, vector<16x128xbf16>
    %c0_1 = arith.constant 0 : index
    %c0_2 = arith.constant 0 : index
    %1 = vector.load %arg2[%c0_1, %c0_2] : memref<128x128xbf16, #tpu.memory_space<vmem>>, vector<128x128xbf16>
    %c0_3 = arith.constant 0 : index
    %c0_4 = arith.constant 0 : index
    %2 = vector.load %arg3[%c0_3, %c0_4] : memref<1x128xf32, #tpu.memory_space<vmem>>, vector<1x128xf32>
    %cst = arith.constant dense<0.000000e+00> : vector<16x128xf32>
    %3 = tpu.matmul %0, %1, %cst {dimension_numbers = #tpu.dot_dimension_numbers<[1], [0], [0], [1], [0, 0, 1, 1], [], []>} : vector<16x128xbf16>, vector<128x128xbf16>, vector<16x128xf32> -> vector<16x128xf32>
    %4 = vector.broadcast %2 : vector<1x128xf32> to vector<16x128xf32>
    %5 = arith.addf %3, %4 : vector<16x128xf32>
    %cst_5 = arith.constant 0.000000e+00 : f32
    %6 = vector.broadcast %cst_5 : f32 to vector<16x128xf32>
    %7 = arith.maximumf %5, %6 : vector<16x128xf32>
    %8 = arith.truncf %7 : vector<16x128xf32> to vector<16x128xbf16>
    %c0_6 = arith.constant 0 : index
    %c0_7 = arith.constant 0 : index
    %9 = vector.load %arg4[%c0_6, %c0_7] : memref<128x256xbf16, #tpu.memory_space<vmem>>, vector<128x256xbf16>
    %c0_8 = arith.constant 0 : index
    %c0_9 = arith.constant 0 : index
    %10 = vector.load %arg5[%c0_8, %c0_9] : memref<1x256xf32, #tpu.memory_space<vmem>>, vector<1x256xf32>
    %cst_10 = arith.constant dense<0.000000e+00> : vector<16x256xf32>
    %11 = tpu.matmul %8, %9, %cst_10 {dimension_numbers = #tpu.dot_dimension_numbers<[1], [0], [0], [1], [0, 0, 1, 1], [], []>} : vector<16x128xbf16>, vector<128x256xbf16>, vector<16x256xf32> -> vector<16x256xf32>
    %12 = vector.broadcast %10 : vector<1x256xf32> to vector<16x256xf32>
    %13 = arith.addf %11, %12 : vector<16x256xf32>
    %cst_11 = arith.constant 0.000000e+00 : f32
    %14 = vector.broadcast %cst_11 : f32 to vector<16x256xf32>
    %15 = arith.maximumf %13, %14 : vector<16x256xf32>
    %16 = arith.truncf %15 : vector<16x256xf32> to vector<16x256xbf16>
    %17 = vector.extract_strided_slice %16 {offsets = [0, 0], sizes = [16, 128], strides = [1, 1]} : vector<16x256xbf16> to vector<16x128xbf16>
    %18 = vector.extract_strided_slice %16 {offsets = [0, 128], sizes = [16, 128], strides = [1, 1]} : vector<16x256xbf16> to vector<16x128xbf16>
    %19 = arith.maximumf %17, %18 : vector<16x128xbf16>
    %20 = vector.extract_strided_slice %19 {offsets = [0, 0], sizes = [16, 64], strides = [1, 1]} : vector<16x128xbf16> to vector<16x64xbf16>
    %21 = vector.extract_strided_slice %19 {offsets = [0, 64], sizes = [16, 64], strides = [1, 1]} : vector<16x128xbf16> to vector<16x64xbf16>
    %22 = arith.maximumf %20, %21 : vector<16x64xbf16>
    %23 = vector.extract_strided_slice %22 {offsets = [0, 0], sizes = [16, 32], strides = [1, 1]} : vector<16x64xbf16> to vector<16x32xbf16>
    %24 = vector.extract_strided_slice %22 {offsets = [0, 32], sizes = [16, 32], strides = [1, 1]} : vector<16x64xbf16> to vector<16x32xbf16>
    %25 = arith.maximumf %23, %24 : vector<16x32xbf16>
    %c0_12 = arith.constant 0 : index
    %c0_13 = arith.constant 0 : index
    %26 = vector.load %arg6[%c0_12, %c0_13] : memref<16x128xbf16, #tpu.memory_space<vmem>>, vector<16x128xbf16>
    %c0_14 = arith.constant 0 : index
    %c0_15 = arith.constant 0 : index
    %27 = vector.load %arg7[%c0_14, %c0_15] : memref<128x512xbf16, #tpu.memory_space<vmem>>, vector<128x512xbf16>
    %c0_16 = arith.constant 0 : index
    %c0_17 = arith.constant 0 : index
    %28 = vector.load %arg8[%c0_16, %c0_17] : memref<1x512xf32, #tpu.memory_space<vmem>>, vector<1x512xf32>
    %cst_18 = arith.constant dense<0.000000e+00> : vector<16x512xf32>
    %29 = tpu.matmul %26, %27, %cst_18 {dimension_numbers = #tpu.dot_dimension_numbers<[1], [0], [0], [1], [0, 0, 1, 1], [], []>} : vector<16x128xbf16>, vector<128x512xbf16>, vector<16x512xf32> -> vector<16x512xf32>
    %30 = vector.broadcast %28 : vector<1x512xf32> to vector<16x512xf32>
    %31 = arith.addf %29, %30 : vector<16x512xf32>
    %cst_19 = arith.constant 0.000000e+00 : f32
    %32 = vector.broadcast %cst_19 : f32 to vector<16x512xf32>
    %33 = arith.maximumf %31, %32 : vector<16x512xf32>
    %34 = arith.truncf %33 : vector<16x512xf32> to vector<16x512xbf16>
    %c0_20 = arith.constant 0 : index
    %c0_21 = arith.constant 0 : index
    %35 = vector.load %arg9[%c0_20, %c0_21] : memref<512x1024xbf16, #tpu.memory_space<vmem>>, vector<512x1024xbf16>
    %c0_22 = arith.constant 0 : index
    %c0_23 = arith.constant 0 : index
    %36 = vector.load %arg10[%c0_22, %c0_23] : memref<1x1024xf32, #tpu.memory_space<vmem>>, vector<1x1024xf32>
    %cst_24 = arith.constant dense<0.000000e+00> : vector<16x1024xf32>
    %37 = tpu.matmul %34, %35, %cst_24 {dimension_numbers = #tpu.dot_dimension_numbers<[1], [0], [0], [1], [0, 0, 1, 1], [], []>} : vector<16x512xbf16>, vector<512x1024xbf16>, vector<16x1024xf32> -> vector<16x1024xf32>
    %38 = vector.broadcast %36 : vector<1x1024xf32> to vector<16x1024xf32>
    %39 = arith.addf %37, %38 : vector<16x1024xf32>
    %cst_25 = arith.constant 0.000000e+00 : f32
    %40 = vector.broadcast %cst_25 : f32 to vector<16x1024xf32>
    %41 = arith.maximumf %39, %40 : vector<16x1024xf32>
    %42 = arith.truncf %41 : vector<16x1024xf32> to vector<16x1024xbf16>
    %43 = vector.extract_strided_slice %42 {offsets = [0, 0], sizes = [16, 512], strides = [1, 1]} : vector<16x1024xbf16> to vector<16x512xbf16>
    %44 = vector.extract_strided_slice %42 {offsets = [0, 512], sizes = [16, 512], strides = [1, 1]} : vector<16x1024xbf16> to vector<16x512xbf16>
    %45 = arith.maximumf %43, %44 : vector<16x512xbf16>
    %46 = vector.extract_strided_slice %45 {offsets = [0, 0], sizes = [16, 256], strides = [1, 1]} : vector<16x512xbf16> to vector<16x256xbf16>
    %47 = vector.extract_strided_slice %45 {offsets = [0, 256], sizes = [16, 256], strides = [1, 1]} : vector<16x512xbf16> to vector<16x256xbf16>
    %48 = arith.maximumf %46, %47 : vector<16x256xbf16>
    %49 = vector.extract_strided_slice %48 {offsets = [0, 0], sizes = [16, 128], strides = [1, 1]} : vector<16x256xbf16> to vector<16x128xbf16>
    %50 = vector.extract_strided_slice %48 {offsets = [0, 128], sizes = [16, 128], strides = [1, 1]} : vector<16x256xbf16> to vector<16x128xbf16>
    %51 = arith.maximumf %49, %50 : vector<16x128xbf16>
    %52 = vector.extract_strided_slice %51 {offsets = [0, 0], sizes = [16, 64], strides = [1, 1]} : vector<16x128xbf16> to vector<16x64xbf16>
    %53 = vector.extract_strided_slice %51 {offsets = [0, 64], sizes = [16, 64], strides = [1, 1]} : vector<16x128xbf16> to vector<16x64xbf16>
    %54 = arith.maximumf %52, %53 : vector<16x64xbf16>
    %55 = tpu.concatenate %25, %54 in 1 : vector<16x32xbf16>, vector<16x64xbf16> -> vector<16x96xbf16>
    %c0_26 = arith.constant 0 : index
    %c0_27 = arith.constant 0 : index
    %56 = vector.load %arg11[%c0_26, %c0_27] : memref<96x128xbf16, #tpu.memory_space<vmem>>, vector<96x128xbf16>
    %c0_28 = arith.constant 0 : index
    %c0_29 = arith.constant 0 : index
    %57 = vector.load %arg12[%c0_28, %c0_29] : memref<1x128xf32, #tpu.memory_space<vmem>>, vector<1x128xf32>
    %cst_30 = arith.constant dense<0.000000e+00> : vector<16x128xf32>
    %58 = tpu.matmul %55, %56, %cst_30 {dimension_numbers = #tpu.dot_dimension_numbers<[1], [0], [0], [1], [0, 0, 1, 1], [], []>} : vector<16x96xbf16>, vector<96x128xbf16>, vector<16x128xf32> -> vector<16x128xf32>
    %59 = vector.broadcast %57 : vector<1x128xf32> to vector<16x128xf32>
    %60 = arith.addf %58, %59 : vector<16x128xf32>
    %cst_31 = arith.constant 0.000000e+00 : f32
    %61 = vector.broadcast %cst_31 : f32 to vector<16x128xf32>
    %62 = arith.maximumf %60, %61 : vector<16x128xf32>
    %63 = arith.truncf %62 : vector<16x128xf32> to vector<16x128xbf16>
    %c0_32 = arith.constant 0 : index
    %c0_33 = arith.constant 0 : index
    %64 = vector.load %arg13[%c0_32, %c0_33] : memref<16x128xbf16, #tpu.memory_space<vmem>>, vector<16x128xbf16>
    tpu.vector_store %arg13[%c0_32, %c0_33], %63 {strides = array<i32>} : memref<16x128xbf16, #tpu.memory_space<vmem>>, vector<16x128xbf16>,
    return
  }
  func.func @transform_0(%arg0: i32) -> (i32, i32) {
    %c0_i32 = arith.constant 0 : i32
    %c0_i32_0 = arith.constant 0 : i32
    return %arg0, %c0_i32 : i32, i32
  }
  func.func @transform_1(%arg0: i32) -> (i32, i32) {
    %c0_i32 = arith.constant 0 : i32
    %c0_i32_0 = arith.constant 0 : i32
    %c0_i32_1 = arith.constant 0 : i32
    return %c0_i32, %c0_i32_0 : i32, i32
  }
  func.func @transform_2(%arg0: i32) -> (i32, i32) {
    %c0_i32 = arith.constant 0 : i32
    %c0_i32_0 = arith.constant 0 : i32
    %c0_i32_1 = arith.constant 0 : i32
    return %c0_i32, %c0_i32_0 : i32, i32
  }
  func.func @transform_3(%arg0: i32) -> (i32, i32) {
    %c0_i32 = arith.constant 0 : i32
    %c0_i32_0 = arith.constant 0 : i32
    %c0_i32_1 = arith.constant 0 : i32
    return %c0_i32, %c0_i32_0 : i32, i32
  }
  func.func @transform_4(%arg0: i32) -> (i32, i32) {
    %c0_i32 = arith.constant 0 : i32
    %c0_i32_0 = arith.constant 0 : i32
    %c0_i32_1 = arith.constant 0 : i32
    return %c0_i32, %c0_i32_0 : i32, i32
  }
  func.func @transform_5(%arg0: i32) -> (i32, i32) {
    %c0_i32 = arith.constant 0 : i32
    %c0_i32_0 = arith.constant 0 : i32
    return %arg0, %c0_i32 : i32, i32
  }
  func.func @transform_6(%arg0: i32) -> (i32, i32) {
    %c0_i32 = arith.constant 0 : i32
    %c0_i32_0 = arith.constant 0 : i32
    %c0_i32_1 = arith.constant 0 : i32
    return %c0_i32, %c0_i32_0 : i32, i32
  }
  func.func @transform_7(%arg0: i32) -> (i32, i32) {
    %c0_i32 = arith.constant 0 : i32
    %c0_i32_0 = arith.constant 0 : i32
    %c0_i32_1 = arith.constant 0 : i32
    return %c0_i32, %c0_i32_0 : i32, i32
  }
  func.func @transform_8(%arg0: i32) -> (i32, i32) {
    %c0_i32 = arith.constant 0 : i32
    %c0_i32_0 = arith.constant 0 : i32
    %c0_i32_1 = arith.constant 0 : i32
    return %c0_i32, %c0_i32_0 : i32, i32
  }
  func.func @transform_9(%arg0: i32) -> (i32, i32) {
    %c0_i32 = arith.constant 0 : i32
    %c0_i32_0 = arith.constant 0 : i32
    %c0_i32_1 = arith.constant 0 : i32
    return %c0_i32, %c0_i32_0 : i32, i32
  }
  func.func @transform_10(%arg0: i32) -> (i32, i32) {
    %c0_i32 = arith.constant 0 : i32
    %c0_i32_0 = arith.constant 0 : i32
    %c0_i32_1 = arith.constant 0 : i32
    return %c0_i32, %c0_i32_0 : i32, i32
  }
  func.func @transform_11(%arg0: i32) -> (i32, i32) {
    %c0_i32 = arith.constant 0 : i32
    %c0_i32_0 = arith.constant 0 : i32
    %c0_i32_1 = arith.constant 0 : i32
    return %c0_i32, %c0_i32_0 : i32, i32
  }
  func.func @transform_12(%arg0: i32) -> (i32, i32) {
    %c0_i32 = arith.constant 0 : i32
    %c0_i32_0 = arith.constant 0 : i32
    return %arg0, %c0_i32 : i32, i32
  }
}

</mosaic_0001>

<bundles_post_ra>
// kernel: tpu_custom_call.1
= control target key start
LH: loop header
LB: loop body
LE: loop exit
PB: predicated region body
PF: predicated region fallthrough
CT: control target
= control target key end

     0   :  { %s4918_s0 = inlined_call_operand.hbm [shape: bf16[64,128], index: 0, kind: input, shape index: {}]   ;;  %s4919_s1 = inlined_call_operand.hbm [shape: bf16[128,128], index: 1, kind: input, shape index: {}]   ;;  %s4920_s2 = inlined_call_operand.vmem [shape: f32[1,128], index: 2, kind: input, shape index: {}]   ;;  %s4921_s3 = inlined_call_operand.hbm [shape: bf16[128,256], index: 3, kind: input, shape index: {}]   ;;  %s4922_s4 = inlined_call_operand.vmem [shape: f32[1,256], index: 4, kind: input, shape index: {}]   ;;  %s4923_s5 = inlined_call_operand.hbm [shape: bf16[64,128], index: 5, kind: input, shape index: {}]   ;;  %s4924_s6 = inlined_call_operand.hbm [shape: bf16[128,512], index: 6, kind: input, shape index: {}]   ;;  %s4925_s7 = inlined_call_operand.vmem [shape: f32[1,512], index: 7, kind: input, shape index: {}]   ;;  %s4926_s8 = inlined_call_operand.hbm [shape: bf16[512,1024], index: 8, kind: input, shape index: {}]   ;;  %s4927_s9 = inlined_call_operand.vmem [shape: f32[1,1024], index: 9, kind: input, shape index: {}]   ;;  %s4928_s10 = inlined_call_operand.hbm [shape: bf16[96,128], index: 10, kind: input, shape index: {}]   ;;  %s4929_s11 = inlined_call_operand.vmem [shape: f32[1,128], index: 11, kind: input, shape index: {}]   ;;  %s4930_s12 = inlined_call_operand.hbm [shape: bf16[64,128], index: 12, kind: output, shape index: {}]  }
   0x1   :  { %4940 = sst [smem:[#allocation23_spill]] %s4919_s1 }
   0x2   :  { %4941 = sst [smem:[#allocation24_spill]] %s4921_s3 }
   0x3   :  { %4942 = sst [smem:[#allocation25_spill]] %s4922_s4 }
   0x4   :  { %4943 = sst [smem:[#allocation26_spill]] %s4924_s6 }
   0x5   :  { %4944 = sst [smem:[#allocation27_spill]] %s4926_s8 }
   0x6   :  { %4945 = sst [smem:[#allocation28_spill]] %s4927_s9 }
   0x7   :  { %4946 = sst [smem:[#allocation29_spill]] %s4928_s10 }
   0x8   :  { %4947 = sst [smem:[#allocation30_spill]] %s4929_s11 }
   0x9   :  { %4948 = sst [smem:[#allocation31_spill]] %s4930_s12 }
   0xa   :  { %17 = vsyncpa [#allocation3], 0 }
   0xb   :  { %19 = vsyncpa [#allocation3 + $0x1], 0 }
   0xc   :  { %20 = vsyncpa [#allocation6], 0 }
   0xd   :  { %21 = vsyncpa [#allocation9], 0 }
   0xe   :  { %23 = vsyncpa [#allocation9 + $0x1], 0 }
   0xf   :  { %24 = vsyncpa [#allocation12], 0 }
  0x10   :  { %25 = vsyncpa [#allocation4], 0 }
  0x11   :  { %27 = vsyncpa [#allocation4 + $0x1], 0  ;;  %s4416_s21 = smov 0   ;;  %s4418_s22 = smov 0  }
  0x12   :  { %s4420_s23 = smov 0   ;;  %s4422_s24 = smov 0  }
  0x13 LB: > { %4949 = sst [smem:[#allocation21_spill]] %s4322_s23  ;;  %s4328_s25 = smov [#allocation5]   ;;  %s4326_s24 = sphi %s4422_s24, %s4983_s24   ;;  %s4322_s23 = sphi %s4420_s23, %s4980_s23   ;;  %s4318_s22 = sphi %s4418_s22, %s4982_s22   ;;  %s4314_s21 = sphi %s4416_s21, %s4981_s21  }
  0x14   : > { %s338_s26 = sshll.u32 %s4328_s25, 4  ;;  %s4437_s27 = sadd.s32 4294967295, %s4326_s24   ;;  %s4442_s26 = int_to_ptr.vmem [resolvable:$true] %s338_s26 }
  0x15   : > { %p3393_p0 = scmp.ge.s32.totalorder %s4326_s24, 1  ;;  %p4934_p1 = scmp.eq.s32.totalorder %s4437_s27, 0 }
  0x16   : > { %p326_p2 = scmp.lt.s32.totalorder %s4326_s24, 5  ;;  %s4329_s29 = smov [#allocation10]  }
  0x17   : > { %s370_s30 = sshll.u32 %s4329_s29, 4  ;;  %s4330_s14 = smov [#allocation11]   ;;  %s4456_s30 = int_to_ptr.vmem [resolvable:$true] %s370_s30 }
  0x18   : > { %p4444_p3 = pnand %p3393_p0, %p326_p2  ;;  %s4458_s15 = sshll.u32 %s4330_s14, 4  ;;  %s387_s15 = int_to_ptr.vmem [resolvable:$true] %s4458_s15 }
  0x19   : > { %s4952_s1 = sld [smem:[#allocation23_spill]] }
  0x1a   : > { %s4950_s28 = scalar_select %p4444_p3, 1, 0 }
  0x1b   : > { %p3865_p4 = pneg %p4444_p3 }
  0x1d   : > { %p4452_p5 = pnand %p3865_p4, %p4934_p1 }
  0x1f   : > { %s4044_s18 = scalar_lea.hbm %s4952_s1, 1024  ;;  %p4468_p7 = pneg %p4452_p5 }
  0x20   : > { %p4045_p6 = scmp.ne.s32.totalorder %s4952_s1, %s4044_s18  ;;  %p4051_p10 = scmp.lt.u32.totalorder %s4044_s18, %s4952_s1 }
  0x22   : > { %p4047_p8 = pnand %p4468_p7, %p4045_p6 }
  0x24   : > { %p4048_p9 = pneg %p4047_p8 }
  0x26   : > { %p4053_p11 = pnand %p4051_p10, %p4048_p9 }
  0x28   : > { %4056 = shalt.err (!%p4053_p11)
}
  0x29   : > { %s4057_s16 = scalar_lea.vmem %s4442_s26, 1024  ;;  %p4065_p2 = scmp.lt.s32.totalorder %s4442_s26, %s4442_s26 }
  0x2a   : > { %p4058_p12 = scmp.ne.s32.totalorder %s4442_s26, %s4057_s16  ;;  %p4066_p4 = scmp.lt.s32.totalorder %s4057_s16, %s4057_s16 }
  0x2c   : > { %p4060_p13 = pnand %p4058_p12, %p4468_p7  ;;  %p4067_p6 = por %p4066_p4, %p4065_p2 }
  0x2e   : > { %p4061_p0 = pneg %p4060_p13 }
  0x30   : > { %p4068_p8 = pnand %p4067_p6, %p4061_p0 }
  0x32   : > { %4071 = shalt.err (!%p4068_p8)
}
  0x33   : > { %s4932_s17 = smov 64   ;;  %s4936_s18 = smov 4  }
  0x34   : > { %3868 = dma.hbm_to_vmem [thread:$0]  (!%p4452_p5), %s4952_s1, 1024, %s4442_s26, [#allocation6], %s4932_s17, %s4932_s17, %s4936_s18  }
  0x35   : > { %s4954_s6 = sld [smem:[#allocation26_spill]] }
  0x3b   : > { %s4072_s16 = scalar_lea.hbm %s4954_s6, 4096 }
  0x3c   : > { %p4073_p9 = scmp.ne.s32.totalorder %s4954_s6, %s4072_s16  ;;  %p4079_p12 = scmp.lt.u32.totalorder %s4072_s16, %s4954_s6 }
  0x3e   : > { %p4075_p10 = pnand %p4073_p9, %p4468_p7 }
  0x40   : > { %p4076_p11 = pneg %p4075_p10 }
  0x42   : > { %p4081_p13 = pnand %p4079_p12, %p4076_p11 }
  0x44   : > { %4084 = shalt.err (!%p4081_p13)
}
  0x45   : > { %s4085_s26 = scalar_lea.vmem %s4456_s30, 4096  ;;  %p4093_p6 = scmp.lt.s32.totalorder %s4456_s30, %s4456_s30 }
  0x46   : > { %p4086_p0 = scmp.ne.s32.totalorder %s4456_s30, %s4085_s26  ;;  %p4094_p8 = scmp.lt.s32.totalorder %s4085_s26, %s4085_s26 }
  0x48   : > { %p4088_p2 = pnand %p4086_p0, %p4468_p7  ;;  %p4095_p9 = por %p4094_p8, %p4093_p6 }
  0x4a   : > { %p4089_p4 = pneg %p4088_p2 }
  0x4c   : > { %p4096_p10 = pnand %p4095_p9, %p4089_p4 }
  0x4e   : > { %4099 = shalt.err (!%p4096_p10)
}
  0x4f   : > { %s4333_s11 = smov 256   ;;  %s4334_s4 = smov 16  }
  0x50   : > { %3874 = dma.hbm_to_vmem [thread:$0]  (!%p4452_p5), %s4954_s6, 4096, %s4456_s30, [#allocation9], %s4333_s11, %s4333_s11, %s4334_s4  }
  0x51   : > { %s4955_s8 = sld [smem:[#allocation27_spill]] }
  0x57   : > { %s4100_s29 = scalar_lea.hbm %s4955_s8, 32768 }
  0x58   : > { %p4101_p11 = scmp.ne.s32.totalorder %s4955_s8, %s4100_s29  ;;  %p4107_p0 = scmp.lt.u32.totalorder %s4100_s29, %s4955_s8 }
  0x5a   : > { %p4103_p12 = pnand %p4101_p11, %p4468_p7 }
  0x5c   : > { %p4104_p13 = pneg %p4103_p12 }
  0x5e   : > { %p4109_p2 = pnand %p4107_p0, %p4104_p13 }
  0x60   : > { %4112 = shalt.err (!%p4109_p2)
}
  0x61   : > { %s4113_s9 = scalar_lea.vmem %s387_s15, 32768  ;;  %p4121_p9 = scmp.lt.s32.totalorder %s387_s15, %s387_s15 }
  0x62   : > { %p4114_p4 = scmp.ne.s32.totalorder %s387_s15, %s4113_s9  ;;  %p4122_p10 = scmp.lt.s32.totalorder %s4113_s9, %s4113_s9 }
  0x64   : > { %p4116_p6 = pnand %p4114_p4, %p4468_p7  ;;  %p4123_p1 = por %p4122_p10, %p4121_p9 }
  0x66   : > { %p4117_p8 = pneg %p4116_p6 }
  0x68   : > { %p4124_p3 = pnand %p4123_p1, %p4117_p8 }
  0x6a   : > { %4127 = shalt.err (!%p4124_p3)
}
  0x6b   : > { %s4335_s30 = smov 512   ;;  %s4336_s11 = smov 32  }
  0x6c   : > { %3877 = dma.hbm_to_vmem [thread:$0]  (!%p4452_p5), %s4955_s8, 32768, %s387_s15, [#allocation12], %s4335_s30, %s4335_s30, %s4336_s11  }
  0x6d   : > { %s4337_s12 = smov [#allocation7]   ;;  %s4956_s3 = sld [smem:[#allocation24_spill]] }
  0x6e   : > { %s354_s19 = sshll.u32 %s4337_s12, 4  ;;  %s355_s19 = int_to_ptr.vmem [resolvable:$true] %s354_s19 }
  0x73   : > { %s4128_s14 = scalar_lea.hbm %s4956_s3, 2048 }
  0x74   : > { %p4129_p1 = scmp.ne.s32.totalorder %s4956_s3, %s4128_s14  ;;  %p4135_p12 = scmp.lt.u32.totalorder %s4128_s14, %s4956_s3 }
  0x76   : > { %p4131_p3 = pnand %p4129_p1, %p4468_p7 }
  0x78   : > { %p4132_p11 = pneg %p4131_p3 }
  0x7a   : > { %p4137_p13 = pnand %p4135_p12, %p4132_p11 }
  0x7c   : > { %4140 = shalt.err (!%p4137_p13)
}
  0x7d   : > { %s4141_s15 = scalar_lea.vmem %s355_s19, 2048  ;;  %p4149_p6 = scmp.lt.s32.totalorder %s355_s19, %s355_s19 }
  0x7e   : > { %p4142_p0 = scmp.ne.s32.totalorder %s355_s19, %s4141_s15  ;;  %p4150_p8 = scmp.lt.s32.totalorder %s4141_s15, %s4141_s15 }
  0x80   : > { %p4144_p2 = pnand %p4142_p0, %p4468_p7  ;;  %p4151_p9 = por %p4150_p8, %p4149_p6 }
  0x82   : > { %p4145_p4 = pneg %p4144_p2 }
  0x84   : > { %p4152_p10 = pnand %p4151_p9, %p4145_p4 }
  0x86   : > { %4155 = shalt.err (!%p4152_p10)
}
  0x87   : > { %s4338_s30 = smov 128   ;;  %s4339_s11 = smov 8  }
  0x88   : > { %3871 = dma.hbm_to_vmem [thread:$0]  (!%p4452_p5), %s4956_s3, 2048, %s355_s19, [#allocation6], %s4338_s30, %s4338_s30, %s4339_s11  }
  0x89   : > { %s4340_s4 = smov [#allocation13]   ;;  %s4957_s10 = sld [smem:[#allocation29_spill]] }
  0x8a   : > { %s402_s12 = sshll.u32 %s4340_s4, 4  ;;  %s403_s12 = int_to_ptr.vmem [resolvable:$true] %s402_s12 }
  0x8f   : > { %s4156_s14 = scalar_lea.hbm %s4957_s10, 768 }
  0x90   : > { %p4157_p1 = scmp.ne.s32.totalorder %s4957_s10, %s4156_s14  ;;  %p4163_p12 = scmp.lt.u32.totalorder %s4156_s14, %s4957_s10 }
  0x92   : > { %p4159_p3 = pnand %p4157_p1, %p4468_p7 }
  0x94   : > { %p4160_p11 = pneg %p4159_p3 }
  0x96   : > { %p4165_p13 = pnand %p4163_p12, %p4160_p11 }
  0x98   : > { %4168 = shalt.err (!%p4165_p13)
}
  0x99   : > { %s4169_s19 = scalar_lea.vmem %s403_s12, 768  ;;  %p4177_p6 = scmp.lt.s32.totalorder %s403_s12, %s403_s12 }
  0x9a   : > { %p4170_p0 = scmp.ne.s32.totalorder %s403_s12, %s4169_s19  ;;  %p4178_p8 = scmp.lt.s32.totalorder %s4169_s19, %s4169_s19 }
  0x9c   : > { %p4172_p2 = pnand %p4170_p0, %p4468_p7  ;;  %p4179_p9 = por %p4178_p8, %p4177_p6 }
  0x9e   : > { %p4173_p4 = pneg %p4172_p2 }
  0xa0   : > { %p4180_p10 = pnand %p4179_p9, %p4173_p4 }
  0xa2   : > { %4183 = shalt.err (!%p4180_p10)
}
  0xa3   : > { %s4958_s30 = smov 4   ;;  %s4959_s11 = smov 64  }
  0xa4   : > { %3880 = dma.hbm_to_vmem [thread:$0]  (!%p4452_p5), %s4957_s10, 768, %s403_s12, [#allocation12], %s4959_s11, %s4959_s11, %s4958_s30  }
  0xa5   : > { %s3392_s13 = sadd.s32 4294967294, %s4326_s24   ;;  %s4575_s25 = sadd.s32 1, %s4326_s24  }
  0xa6   : > { %s40_s4 = sadd.s32 1, %s4322_s23  ;;  %s37_s20 = ssub.s32 %s4326_s24, %s4575_s25 }
  0xa7   : > { %p47_p7 = scmp.ne.s32.totalorder %s4322_s23, %s4318_s22  ;;  %p38_p1 = scmp.eq.s32.totalorder %s37_s20, 0 }
  0xa8   : > { %p48_p3 = scmp.eq.s32.totalorder %s4326_s24, 0  ;;  %p53_p11 = scmp.ne.s32.totalorder %s4318_s22, %s4314_s21 }
  0xa9   : > { %p313_p12 = scmp.eq.s32.totalorder %s4437_s27, 3  ;;  %p4961_p0 = scmp.eq.s32.totalorder %s4437_s27, 0 }
  0xaa   : > { %s4587_s29 = scalar_select %p38_p1, %s4322_s23, %s40_s4  }
  0xab   : > { %p49_p13 = por %p48_p3, %p47_p7  ;;  %p4591_p2 = por %p4961_p0, %p53_p11 }
  0xac   : > { %4960 = sst [smem:[#allocation22_spill]] %s4587_s29  ;;  %p4595_p5 = por %p313_p12, %p47_p7 }
  0xad   : > { %p319_p4 = scmp.eq.s32.totalorder %s3392_s13, 3  ;;  %p3897_p6 = scmp.lt.s32.totalorder %s4326_s24, 4 }
  0xae   : > { %s4963_s12 = scalar_select %p4595_p5, 1, 0 }
  0xaf   : > { %s419_s16 = sand.u32 1, %s4322_s23   ;;  %p4601_p8 = por %p319_p4, %p53_p11 }
  0xb0   : > { %s4605_s9 = sshll.u32 %s419_s16, 3  ;;  %s3745_s15 = sshll.u32 %s4326_s24, 7 }
  0xb1   : > { %s4964_s26 = scalar_select %p4601_p8, 1, 0 }
  0xb2   : > { %s4611_s17 = scalar_lea.hbm %s4918_s0, %s3745_s15  ;;  %s423_s13 = scalar_lea.vmem [#allocation2], %s4605_s9 }
  0xb3   : > { %s430_s4 = sshll.u32 %s423_s13, 4  ;;  %p4614_p9 = pnand %p3897_p6, %p49_p13  ;;  %s4618_s4 = int_to_ptr.vmem [resolvable:$true] %s430_s4 }
  0xb4   : > { %s4623_s19 = scalar_lea.hbm %s4923_s5, %s3745_s15  ;;  %s4625_s18 = scalar_lea.sflag [#allocation3], %s419_s16 }
  0xb5   : > { %s4184_s6 = scalar_lea.hbm %s4611_s17, 128  ;;  %p4186_p7 = pneg %p4614_p9 }
  0xb6   : > { %p4185_p10 = scmp.ne.s32.totalorder %s4611_s17, %s4184_s6  ;;  %s4189_s10 = scalar_lea.hbm %s4918_s0, 512 }
  0xb7   : > { %p4190_p11 = scmp.lt.u32.totalorder %s4611_s17, %s4918_s0  ;;  %p4191_p12 = scmp.lt.u32.totalorder %s4189_s10, %s4184_s6 }
  0xb8   : > { %p4187_p1 = pnand %p4186_p7, %p4185_p10  ;;  %p4193_p0 = scmp.lt.u32.totalorder %s4184_s6, %s4611_s17 }
  0xb9   : > { %p4192_p13 = por %p4191_p12, %p4190_p11 }
  0xba   : > { %p4188_p3 = pneg %p4187_p1 }
  0xbb   : > { %p4194_p4 = por %p4193_p0, %p4192_p13 }
  0xbd   : > { %p4195_p6 = pnand %p4194_p4, %p4188_p3 }
  0xbf   : > { %4198 = shalt.err (!%p4195_p6)
}
  0xc0   : > { %s4199_s1 = scalar_lea.vmem %s4618_s4, 128  ;;  %s4341_s3 = smov [#allocation2]  }
  0xc1   : > { %p4200_p10 = scmp.ne.s32.totalorder %s4618_s4, %s4199_s1  ;;  %s4204_s8 = sshll.u32 %s4341_s3, 4  ;;  %s4205_s8 = int_to_ptr.vmem [resolvable:$false] %s4204_s8 }
  0xc2   : > { %s4206_s23 = scalar_lea.vmem %s4205_s8, 256  ;;  %p4207_p5 = scmp.lt.s32.totalorder %s4618_s4, %s4205_s8 }
  0xc3   : > { %p4202_p1 = pnand %p4200_p10, %p4186_p7  ;;  %p4208_p11 = scmp.lt.s32.totalorder %s4206_s23, %s4199_s1 }
  0xc5   : > { %p4203_p8 = pneg %p4202_p1  ;;  %p4209_p12 = por %p4208_p11, %p4207_p5 }
  0xc7   : > { %p4210_p13 = pnand %p4209_p12, %p4203_p8 }
  0xc9   : > { %4213 = shalt.err (!%p4210_p13)
}
  0xca   : > { %3884 = dma.hbm_to_vmem [thread:$0]  (!%p4614_p9), %s4611_s17, 128, %s4618_s4, %s4625_s18, %s4959_s11, %s4959_s11, %s4958_s30  }
  0xcb   : > { %s444_s6 = scalar_lea.vmem [#allocation8], %s4605_s9  ;;  %s440_s29 = sand.u32 1, %s4326_s24  }
  0xcc   : > { %s451_s10 = sshll.u32 %s444_s6, 4  ;;  %s4660_s16 = scalar_lea.sflag [#allocation9], %s440_s29  ;;  %s4658_s10 = int_to_ptr.vmem [resolvable:$true] %s451_s10 }
  0xcd   : > { %s4214_s15 = scalar_lea.hbm %s4623_s19, 128  ;;  %s4219_s3 = scalar_lea.hbm %s4923_s5, 512 }
  0xce   : > { %p4215_p5 = scmp.ne.s32.totalorder %s4623_s19, %s4214_s15  ;;  %p4220_p0 = scmp.lt.u32.totalorder %s4623_s19, %s4923_s5 }
  0xcf   : > { %p4221_p4 = scmp.lt.u32.totalorder %s4219_s3, %s4214_s15  ;;  %p4223_p10 = scmp.lt.u32.totalorder %s4214_s15, %s4623_s19 }
  0xd0   : > { %p4217_p8 = pnand %p4215_p5, %p4186_p7 }
  0xd1   : > { %p4222_p6 = por %p4221_p4, %p4220_p0 }
  0xd2   : > { %p4218_p3 = pneg %p4217_p8 }
  0xd3   : > { %p4224_p1 = por %p4223_p10, %p4222_p6 }
  0xd5   : > { %p4225_p11 = pnand %p4224_p1, %p4218_p3 }
  0xd7   : > { %4228 = shalt.err (!%p4225_p11)
}
  0xd8   : > { %s4229_s9 = scalar_lea.vmem %s4658_s10, 128  ;;  %s4342_s17 = smov [#allocation8]  }
  0xd9   : > { %p4230_p12 = scmp.ne.s32.totalorder %s4658_s10, %s4229_s9  ;;  %s4234_s4 = sshll.u32 %s4342_s17, 4  ;;  %s4235_s4 = int_to_ptr.vmem [resolvable:$false] %s4234_s4 }
  0xda   : > { %s4236_s18 = scalar_lea.vmem %s4235_s4, 256  ;;  %p4237_p8 = scmp.lt.s32.totalorder %s4658_s10, %s4235_s4 }
  0xdb   : > { %p4232_p13 = pnand %p4230_p12, %p4186_p7  ;;  %p4238_p0 = scmp.lt.s32.totalorder %s4236_s18, %s4229_s9 }
  0xdd   : > { %p4233_p5 = pneg %p4232_p13  ;;  %p4239_p4 = por %p4238_p0, %p4237_p8 }
  0xdf   : > { %p4240_p6 = pnand %p4239_p4, %p4233_p5 }
  0xe1   : > { %4243 = shalt.err (!%p4240_p6)
}
  0xe2   : > { %3887 = dma.hbm_to_vmem [thread:$0]  (!%p4614_p9), %s4623_s19, 128, %s4658_s10, %s4660_s16, %s4959_s11, %s4959_s11, %s4958_s30  }
  0xe3   : > { %p4966_p7 = scmp.ne.s32.totalorder %s4950_s28, 0 }
  0xe4   : > { %s4692_s6 = sand.u32 (!%p4966_p7), 1, %s4318_s22  }
  0xe5   : > { %463 = sbr.rel (%p4966_p7) target bundleno = 1580 (0x62c), region = 68  ;;  %s4695_s29 = sshll.u32 (!%p4966_p7), %s4692_s6, 3 }
  0xe6   : > { %s466_s20 = scalar_lea.sflag (!%p4966_p7), [#allocation3], %s4692_s6  ;;  %s469_s15 = scalar_lea.vmem (!%p4966_p7), [#allocation2], %s4695_s29 }
  0xec   : > { %4289 = dma.done.wait (%p4591_p2), %s466_s20, 128  }
  0xed   : > { %4291 = vsyncadd (%p4591_p2), %s466_s20, 4294967168  ;;  %p4967_p9 = scmp.eq.s32.totalorder %s4437_s27, 0 }
  0xef   : > { %4293 = dma.done.wait (%p4967_p9), [#allocation6], 3072   ;;  %p4968_p3 = pmov %p4967_p9 }
  0xf0   : > { %s482_s28 = sand.u32 1, %s4437_s27   ;;  %s486_s11 = scalar_lea.vmem [#allocation8], %s4695_s29 }
  0xf1   : > { %4295 = vsyncadd (%p4968_p3), [#allocation6], 4294964224  ;;  %s483_s30 = scalar_lea.sflag [#allocation9], %s482_s28 }
  0xf2   : > { %4297 = dma.done.wait (%p4591_p2), %s483_s30, 128  }
  0xf3   : > { %4299 = vsyncadd (%p4591_p2), %s483_s30, 4294967168  ;;  %p4969_p10 = pmov %p4968_p3 }
  0xf4   : > { %p4970_p1 = pmov %p4968_p3 }
  0xf5   : > { %4301 = dma.done.wait (%p4969_p10), [#allocation9], 4096  }
  0xf6   : > { %4303 = vsyncadd (%p4970_p1), [#allocation9], 4294963200  ;;  %p4971_p11 = pmov %p4970_p1 }
  0xf7   : > { %p4972_p12 = pmov %p4970_p1 }
  0xf8   : > { %4305 = dma.done.wait (%p4971_p11), [#allocation12], 33536  }
  0xf9   : > { %4307 = vsyncadd (%p4972_p12), [#allocation12], 4294933760  ;;  %v4343_v0 = vmov 0.0   ;;  %vm4344_vm0 = vmmov 0   ;;  %v4345_v1 = vmov 0   ;;  %v3956_v2 = vld [vmem:[#allocation5] sm:$0xff]  }
  0xfa   : > { %3771 = vmatprep.subr.bf16.mxu0 %v4343_v0  ;;  %3787 = vmatprep.mubr.msk.bf16.mxu0 %vm4344_vm0, %v4343_v0  ;;  %v3957_v3 = vld [vmem:[#allocation5 + $0x8] sm:$0xff]   ;;  %v3958_v4 = vld [vmem:[#allocation5 + $0x10] sm:$0xff]   ;;  %v3959_v5 = vld [vmem:[#allocation5 + $0x18] sm:$0xff]   ;;  %s4973_s3 = sld [smem:[#allocation25_spill]]  ;;  %s4346_s8 = smov 64   ;;  %vm3120_vm1 = vcmask 261120  }
  0xfb   : > { %811 = vmatprep.mubr.bf16.mxu1 %v4345_v1  ;;  %3772 = vmatpush3.bf16.msra.mxu0 %v3956_v2  ;;  %v3960_v6 = vld [vmem:[#allocation5 + $0x20] sm:$0xff]   ;;  %v3961_v7 = vld [vmem:[#allocation5 + $0x28] sm:$0xff]   ;;  %v3962_v8 = vld [vmem:[#allocation5 + $0x30] sm:$0xff]   ;;  %s4347_s23 = smov 96   ;;  %s4974_s4 = sld [smem:[#allocation28_spill]]  ;;  %vm3179_vm2 = vcmask 785408  }
  0xfc   : > { %3773 = vmatprep.subr.bf16.mxu0 %v4343_v0  ;;  %v3990_v9 = vld [vmem:[#allocation7 + $0x4] ss:$8 sps:$4 sm:$0xff]   ;;  %v3992_v10 = vld [vmem:[#allocation7] ss:$8 sps:$4 sm:$0xff]   ;;  %v3993_v11 = vld [vmem:[#allocation7 + $0x14] ss:$8 sps:$4 sm:$0xff]  }
  0xfd   : > { %779 = vmatprep.subr.bf16.mxu1 %v3990_v9  ;;  %v3995_v12 = vld [vmem:[#allocation7 + $0x10] ss:$8 sps:$4 sm:$0xff]   ;;  %v3996_v13 = vld [vmem:[#allocation7 + $0x24] ss:$8 sps:$4 sm:$0xff]   ;;  %v3998_v18 = vld [vmem:[#allocation7 + $0x20] ss:$8 sps:$4 sm:$0xff]  }
  0xfe   : > { %780 = vmatpush1.bf16.msra.mxu1 %v3992_v10  ;;  %v3963_v14 = vld [vmem:[#allocation5 + $0x38] sm:$0xff]   ;;  %v3967_v16 = vld [vmem:[#allocation10 + $0x4] ss:$16 sps:$4 sm:$0xff]   ;;  %v3965_v17 = vld [vmem:[#allocation10] ss:$16 sps:$4 sm:$0xff]   ;;  %s4348_s18 = smov 32  }
  0xff   : > { %3774 = vmatpush3.bf16.msra.mxu0 %v3957_v3  ;;  %781 = vmatprep.subr.bf16.mxu1 %v3993_v11  ;;  %v3964_v15 = vld [vmem:[%s469_s15] sm:$0xff]   ;;  %v4002_v22 = vld [vmem:[#allocation7 + $0x44] ss:$8 sps:$4 sm:$0xff]   ;;  %v4004_v25 = vld [vmem:[#allocation7 + $0x40] ss:$8 sps:$4 sm:$0xff]   ;;  %s4975_s28 = sld [smem:[#allocation30_spill]] }
 0x100   : > { %3775 = vmatprep.subr.bf16.mxu0 %v4343_v0  ;;  %v3999_v19 = vld [vmem:[#allocation7 + $0x34] ss:$8 sps:$4 sm:$0xff]   ;;  %v4001_v21 = vld [vmem:[#allocation7 + $0x30] ss:$8 sps:$4 sm:$0xff]   ;;  %v4737_v39 = vld [vmem:[%s486_s11] sm:$0xff]   ;;  %s543_s30 = scalar_lea.vmem [#allocation14], %s4695_s29 }
 0x101   : > { %v3970_v20 = vld [vmem:[#allocation10 + $0x24] ss:$16 sps:$4 sm:$0xff]   ;;  %v3968_v23 = vld [vmem:[#allocation10 + $0x20] ss:$16 sps:$4 sm:$0xff]   ;;  %v4016_v44 = vld [vmem:[#allocation10 + $0xc] ss:$16 sps:$4 sm:$0xff]  }
 0x102   : > { %782 = vmatpush1.bf16.msra.mxu1 %v3995_v12  ;;  %v3973_v24 = vld [vmem:[#allocation10 + $0x44] ss:$16 sps:$4 sm:$0xff]   ;;  %v3971_v27 = vld [vmem:[#allocation10 + $0x40] ss:$16 sps:$4 sm:$0xff]   ;;  %s3249_s11 = sshll.u32 %s543_s30, 4  ;;  %s3749_s14 = sshll.u32 %s4437_s27, 7  ;;  %s4868_s11 = int_to_ptr.vmem [resolvable:$true] %s3249_s11 }
 0x103   : > { %3776 = vmatpush3.bf16.msra.mxu0 %v3958_v4  ;;  %783 = vmatprep.subr.bf16.mxu1 %v3996_v13  ;;  %v4005_v26 = vld [vmem:[#allocation7 + $0x54] ss:$8 sps:$4 sm:$0xff]   ;;  %v4007_v29 = vld [vmem:[#allocation7 + $0x50] ss:$8 sps:$4 sm:$0xff]   ;;  %v4008_v40 = vld [vmem:[#allocation7 + $0x64] ss:$8 sps:$4 sm:$0xff]  }
 0x104   : > { %3777 = vmatprep.subr.bf16.mxu0 %v4343_v0  ;;  %v3976_v28 = vld [vmem:[#allocation10 + $0x64] ss:$16 sps:$4 sm:$0xff]   ;;  %v3974_v30 = vld [vmem:[#allocation10 + $0x60] ss:$16 sps:$4 sm:$0xff]   ;;  %s4976_s16 = sld [smem:[#allocation31_spill]]  ;;  %s3236_s1 = scalar_lea.sflag [#allocation4], %s4692_s6 }
 0x105   : > { %v3979_v31 = vld [vmem:[#allocation10 + $0x84] ss:$16 sps:$4 sm:$0xff]   ;;  %v3977_v32 = vld [vmem:[#allocation10 + $0x80] ss:$16 sps:$4 sm:$0xff]   ;;  %p4977_p13 = scmp.ne.s32.totalorder %s4963_s12, 0  ;;  %s4349_s27 = smov [#allocation14]  }
 0x106   : > { %784 = vmatpush1.bf16.msra.mxu1 %v3998_v18  ;;  %v3982_v33 = vld [vmem:[#allocation10 + $0xa4] ss:$16 sps:$4 sm:$0xff]   ;;  %v3980_v34 = vld [vmem:[#allocation10 + $0xa0] ss:$16 sps:$4 sm:$0xff]   ;;  %s4248_s29 = sshll.u32 %s4349_s27, 4  ;;  %s4249_s29 = int_to_ptr.vmem [resolvable:$false] %s4248_s29 }
 0x107   : > { %3778 = vmatpush3.bf16.msra.mxu0 %v3959_v5  ;;  %785 = vmatprep.subr.bf16.mxu1 %v3999_v19  ;;  %v3985_v35 = vld [vmem:[#allocation10 + $0xc4] ss:$16 sps:$4 sm:$0xff]   ;;  %v3983_v36 = vld [vmem:[#allocation10 + $0xc0] ss:$16 sps:$4 sm:$0xff]   ;;  %p4251_p0 = scmp.lt.s32.totalorder %s4868_s11, %s4249_s29 }
 0x108   : > { %3779 = vmatprep.subr.bf16.mxu0 %v4343_v0  ;;  %v3988_v37 = vld [vmem:[#allocation10 + $0xe4] ss:$16 sps:$4 sm:$0xff]   ;;  %v3986_v38 = vld [vmem:[#allocation10 + $0xe0] ss:$16 sps:$4 sm:$0xff]  }
 0x109   : > { %v4010_v41 = vld [vmem:[#allocation7 + $0x60] ss:$8 sps:$4 sm:$0xff]   ;;  %v4011_v42 = vld [vmem:[#allocation7 + $0x74] ss:$8 sps:$4 sm:$0xff]   ;;  %v4013_v43 = vld [vmem:[#allocation7 + $0x70] ss:$8 sps:$4 sm:$0xff]  }
 0x10a   : > { %786 = vmatpush1.bf16.msra.mxu1 %v4001_v21  ;;  %v1159_v45 = vld [vmem:[#allocation11] sm:$0xff]  ;;  %s4873_s13 = scalar_lea.hbm %s4976_s16, %s3749_s14 }
 0x10b   : > { %3780 = vmatpush3.bf16.msra.mxu0 %v3960_v6  ;;  %787 = vmatprep.subr.bf16.mxu1 %v4002_v22  ;;  %v1163_v46 = vld [vmem:[#allocation11 + $0x20] sm:$0xff] }
 0x10c   : > { %3781 = vmatprep.subr.bf16.mxu0 %v4343_v0  ;;  %v3474_v47 = vcombine.low %v1159_v45, %v1163_v46  ;;  %v3475_v48 = vcombine.high %v1159_v45, %v1163_v46  ;;  %v1167_v49 = vld [vmem:[#allocation11 + $0x40] sm:$0xff] }
 0x10d   : > { %v1171_v50 = vld [vmem:[#allocation11 + $0x60] sm:$0xff] }
 0x10e   : > { %788 = vmatpush1.bf16.msra.mxu1 %v4004_v25  ;;  %v3483_v51 = vcombine.high %v1167_v49, %v1171_v50  ;;  %v3482_v52 = vcombine.low %v1167_v49, %v1171_v50  ;;  %v1175_v53 = vld [vmem:[#allocation11 + $0x80] sm:$0xff] }
 0x10f   : > { %3782 = vmatpush3.bf16.msra.mxu0 %v3961_v7  ;;  %789 = vmatprep.subr.bf16.mxu1 %v4005_v26  ;;  %v1179_v54 = vld [vmem:[#allocation11 + $0xa0] sm:$0xff] }
 0x110   : > { %3783 = vmatprep.subr.bf16.mxu0 %v4343_v0  ;;  %v3491_v55 = vcombine.high %v1175_v53, %v1179_v54  ;;  %v3490_v56 = vcombine.low %v1175_v53, %v1179_v54  ;;  %v1183_v57 = vld [vmem:[#allocation11 + $0xc0] sm:$0xff] }
 0x111   : > { %v1187_v58 = vld [vmem:[#allocation11 + $0xe0] sm:$0xff] }
 0x112   : > { %790 = vmatpush1.bf16.msra.mxu1 %v4007_v29  ;;  %v3499_v59 = vcombine.high %v1183_v57, %v1187_v58  ;;  %v3498_v60 = vcombine.low %v1183_v57, %v1187_v58  ;;  %v1191_v61 = vld [vmem:[#allocation11 + $0x100] sm:$0xff] }
 0x113   : > { %3784 = vmatpush3.bf16.msra.mxu0 %v3962_v8  ;;  %791 = vmatprep.subr.bf16.mxu1 %v4008_v40  ;;  %v1195_v62 = vld [vmem:[#allocation11 + $0x120] sm:$0xff] }
 0x114   : > { %3785 = vmatprep.subr.bf16.mxu0 %v4343_v0  ;;  %v3507_v63 = vcombine.high %v1191_v61, %v1195_v62  ;;  %v3506_v2 = vcombine.low %v1191_v61, %v1195_v62  ;;  %v1199_v3 = vld [vmem:[#allocation11 + $0x140] sm:$0xff]  ;;  %v4014_v61 = vld [vmem:[#allocation10 + $0x8] ss:$16 sps:$4 sm:$0xff]  }
 0x115   : > { %v1203_v4 = vld [vmem:[#allocation11 + $0x160] sm:$0xff] }
 0x116   : > { %792 = vmatpush1.bf16.msra.mxu1 %v4010_v41  ;;  %v3515_v5 = vcombine.high %v1199_v3, %v1203_v4  ;;  %v3514_v6 = vcombine.low %v1199_v3, %v1203_v4  ;;  %v1207_v7 = vld [vmem:[#allocation11 + $0x180] sm:$0xff]  ;;  %v4022_v3 = vld [vmem:[#allocation10 + $0x4c] ss:$16 sps:$4 sm:$0xff]   ;;  %v4020_v4 = vld [vmem:[#allocation10 + $0x48] ss:$16 sps:$4 sm:$0xff]  }
 0x117   : > { %3786 = vmatpush3.bf16.msra.mxu0 %v3963_v14  ;;  %793 = vmatprep.subr.bf16.mxu1 %v4011_v42  ;;  %v1211_v8 = vld [vmem:[#allocation11 + $0x1a0] sm:$0xff] }
 0x118   : > { %1061 = vmatprep.subr.bf16.mxu0 %v3967_v16  ;;  %v3523_v9 = vcombine.high %v1207_v7, %v1211_v8  ;;  %v3522_v10 = vcombine.low %v1207_v7, %v1211_v8  ;;  %v1215_v11 = vld [vmem:[#allocation11 + $0x1c0] sm:$0xff]  ;;  %v4023_v7 = vld [vmem:[#allocation10 + $0x68] ss:$16 sps:$4 sm:$0xff]   ;;  %v4028_v8 = vld [vmem:[#allocation10 + $0x8c] ss:$16 sps:$4 sm:$0xff]  }
 0x119   : > { %v1219_v12 = vld [vmem:[#allocation11 + $0x1e0] sm:$0xff] }
 0x11a   : > { %3788 = vmatmul.mubr.bf16.vlgmr.msra.gmra.mrb[0].mxu0 %v3964_v15  ;;  %794 = vmatpush1.bf16.msra.mxu1 %v4013_v43  ;;  %v3531_v13 = vcombine.high %v1215_v11, %v1219_v12  ;;  %v3530_v14 = vcombine.low %v1215_v11, %v1219_v12  ;;  %v1223_v15 = vld [vmem:[#allocation11 + $0x200] sm:$0xff]  ;;  %v4031_v11 = vld [vmem:[#allocation10 + $0xac] ss:$16 sps:$4 sm:$0xff]  }
 0x11b   : > { %1062 = vmatpush1.bf16.msra.mxu0 %v3965_v17  ;;  %1093 = vmatprep.mubr.bf16.mxu0 %v4345_v1  ;;  %v1227_v16 = vld [vmem:[#allocation11 + $0x220] sm:$0xff] }
 0x11c   : > { %1063 = vmatprep.subr.bf16.mxu0 %v3970_v20  ;;  %1104 = vmatprep.subr.bf16.mxu1 %v4016_v44  ;;  %v3539_v17 = vcombine.high %v1223_v15, %v1227_v16  ;;  %v3538_v18 = vcombine.low %v1223_v15, %v1227_v16  ;;  %v1231_v19 = vld [vmem:[#allocation11 + $0x240] sm:$0xff]  ;;  %v4034_v15 = vld [vmem:[#allocation10 + $0xcc] ss:$16 sps:$4 sm:$0xff]  }
 0x11d   : > { %v1235_v20 = vld [vmem:[#allocation11 + $0x260] sm:$0xff] }
 0x11e   : > { %v3547_v21 = vcombine.high %v1231_v19, %v1235_v20  ;;  %v3546_v22 = vcombine.low %v1231_v19, %v1235_v20  ;;  %v1271_v40 = vld [vmem:[#allocation11 + $0x380] sm:$0xff]  ;;  %v4037_v19 = vld [vmem:[#allocation10 + $0xec] ss:$16 sps:$4 sm:$0xff]  }
 0x11f   : > { %1064 = vmatpush1.bf16.msra.mxu0 %v3968_v23  ;;  %v1239_v23 = vld [vmem:[#allocation11 + $0x280] sm:$0xff]  ;;  %v1160_v20 = vld [vmem:[#allocation11 + $0x8] sm:$0xff] }
 0x120   : > { %1065 = vmatprep.subr.bf16.mxu0 %v3973_v24  ;;  %v1243_v24 = vld [vmem:[#allocation11 + $0x2a0] sm:$0xff] }
 0x121   : > { %v3555_v25 = vcombine.high %v1239_v23, %v1243_v24  ;;  %v3554_v26 = vcombine.low %v1239_v23, %v1243_v24  ;;  %v1275_v41 = vld [vmem:[#allocation11 + $0x3a0] sm:$0xff] }
 0x122   : > { %v3587_v42 = vcombine.high %v1271_v40, %v1275_v41  ;;  %v3586_v43 = vcombine.low %v1271_v40, %v1275_v41  ;;  %v1279_v44 = vld [vmem:[#allocation11 + $0x3c0] sm:$0xff] }
 0x123   : > { %1066 = vmatpush1.bf16.msra.mxu0 %v3971_v27  ;;  %v1247_v27 = vld [vmem:[#allocation11 + $0x2c0] sm:$0xff] }
 0x124   : > { %1067 = vmatprep.subr.bf16.mxu0 %v3976_v28  ;;  %v1251_v28 = vld [vmem:[#allocation11 + $0x2e0] sm:$0xff] }
 0x125   : > { %v3563_v29 = vcombine.high %v1247_v27, %v1251_v28  ;;  %v1283_v45 = vld [vmem:[#allocation11 + $0x3e0] sm:$0xff] }
 0x126   : > { %v3595_v46 = vcombine.high %v1279_v44, %v1283_v45  ;;  %v4742_v49 = vld [vmem:[#allocation11 + $0x420] sm:$0xff] }
 0x127   : > { %1068 = vmatpush1.bf16.msra.mxu0 %v3974_v30  ;;  %v3562_v30 = vcombine.low %v1247_v27, %v1251_v28 }
 0x128   : > { %1069 = vmatprep.subr.bf16.mxu0 %v3979_v31  ;;  %v1255_v31 = vld [vmem:[#allocation11 + $0x300] sm:$0xff] }
 0x12b   : > { %1070 = vmatpush1.bf16.msra.mxu0 %v3977_v32  ;;  %v1259_v32 = vld [vmem:[#allocation11 + $0x320] sm:$0xff] }
 0x12c   : > { %1071 = vmatprep.subr.bf16.mxu0 %v3982_v33  ;;  %v3571_v33 = vcombine.high %v1255_v31, %v1259_v32 }
 0x12f   : > { %1072 = vmatpush1.bf16.msra.mxu0 %v3980_v34  ;;  %v3570_v34 = vcombine.low %v1255_v31, %v1259_v32  ;;  %v1168_v32 = vld [vmem:[#allocation11 + $0x48] sm:$0xff] }
 0x130   : > { %1073 = vmatprep.subr.bf16.mxu0 %v3985_v35  ;;  %v1263_v35 = vld [vmem:[#allocation11 + $0x340] sm:$0xff] }
 0x133   : > { %1074 = vmatpush1.bf16.msra.mxu0 %v3983_v36  ;;  %v1267_v36 = vld [vmem:[#allocation11 + $0x360] sm:$0xff] }
 0x134   : > { %1075 = vmatprep.subr.bf16.mxu0 %v3988_v37  ;;  %v3579_v37 = vcombine.high %v1263_v35, %v1267_v36 }
 0x137   : > { %1076 = vmatpush1.bf16.msra.mxu0 %v3986_v38  ;;  %v3578_v38 = vcombine.low %v1263_v35, %v1267_v36 }
 0x138   : > { %2737 = vmatprep.subr.bf16.mxu0 %v3475_v48  ;;  %v4740_v48 = vld [vmem:[#allocation11 + $0x400] sm:$0xff] }
 0x139   : > { %v3602_v50 = vcombine.low %v4740_v48, %v4742_v49 }
 0x13a   : > { %1094 = vmatmul.mubr.bf16.vlgmr.msra.gmra.mrb[4].mxu0 %v4737_v39 }
 0x13b   : > { %2738 = vmatpush1.bf16.msra.mxu0 %v3474_v47  ;;  %v3594_v47 = vcombine.low %v1279_v44, %v1283_v45  ;;  %v1176_v44 = vld [vmem:[#allocation11 + $0x88] sm:$0xff] }
 0x13c   : > { %2739 = vmatprep.subr.bf16.mxu0 %v3483_v51  ;;  %v3603_v51 = vcombine.high %v4740_v48, %v4742_v49  ;;  %v1180_v45 = vld [vmem:[#allocation11 + $0xa8] sm:$0xff]  ;;  %v1319_v49 = vld [vmem:[#allocation11 + $0x500] sm:$0xff] }
 0x13f   : > { %2740 = vmatpush1.bf16.msra.mxu0 %v3482_v52  ;;  %v3415_v52 = vld [vmem:[%s4920_s2] ss:$0 sm:$0xff] }
 0x140   : > { %2741 = vmatprep.subr.bf16.mxu0 %v3491_v55 }
 0x143   : > { %2742 = vmatpush1.bf16.msra.mxu0 %v3490_v56 }
 0x144   : > { %2743 = vmatprep.subr.bf16.mxu0 %v3499_v59 }
 0x147   : > { %2744 = vmatpush1.bf16.msra.mxu0 %v3498_v60 }
 0x148   : > { %2745 = vmatprep.subr.bf16.mxu0 %v3507_v63  ;;  %v4019_v63 = vld [vmem:[#allocation10 + $0x2c] ss:$16 sps:$4 sm:$0xff]  }
 0x14b   : > { %2746 = vmatpush1.bf16.msra.mxu0 %v3506_v2  ;;  %v4017_v2 = vld [vmem:[#allocation10 + $0x28] ss:$16 sps:$4 sm:$0xff]  }
 0x14c   : > { %2747 = vmatprep.subr.bf16.mxu0 %v3515_v5  ;;  %v4025_v5 = vld [vmem:[#allocation10 + $0x6c] ss:$16 sps:$4 sm:$0xff]  }
 0x14f   : > { %2748 = vmatpush1.bf16.msra.mxu0 %v3514_v6  ;;  %v689_v6 = vlaneseq }
 0x150   : > { %2749 = vmatprep.subr.bf16.mxu0 %v3523_v9 }
 0x151   : > { %v4752_v9 = vshrl.u32 %v689_v6, 7  ;;  %v1204_v6 = vld [vmem:[#allocation11 + $0x168] sm:$0xff] }
 0x153   : > { %2750 = vmatpush1.bf16.msra.mxu0 %v3522_v10  ;;  %v4026_v10 = vld [vmem:[#allocation10 + $0x88] ss:$16 sps:$4 sm:$0xff]   ;;  %v4755_v12 = vsub.s32 0, %v4752_v9 }
 0x154   : > { %2751 = vmatprep.subr.bf16.mxu0 %v3531_v13  ;;  %v4760_v13 = vld [vmem:[%s4925_s7] sm:$0xf] }
 0x155   : > { %v878_v16 = vrot.slane %v4760_v13, %v4755_v12 }
 0x157   : > { %2752 = vmatpush1.bf16.msra.mxu0 %v3530_v14  ;;  %v4763_v14 = vsub.s32 1, %v4752_v9 }
 0x158   : > { %2753 = vmatprep.subr.bf16.mxu0 %v3539_v17  ;;  %v4032_v17 = vld [vmem:[#allocation10 + $0xc8] ss:$16 sps:$4 sm:$0xff]  }
 0x15b   : > { %2754 = vmatpush1.bf16.msra.mxu0 %v3538_v18  ;;  %v882_v18 = vrot.slane %v4760_v13, %v4763_v14 }
 0x15c   : > { %2755 = vmatprep.subr.bf16.mxu0 %v3547_v21  ;;  %v1164_v21 = vld [vmem:[#allocation11 + $0x28] sm:$0xff] }
 0x15d   : > { %v3477_v28 = vcombine.high %v1160_v20, %v1164_v21 }
 0x15f   : > { %2756 = vmatpush1.bf16.msra.mxu0 %v3546_v22 }
 0x160   : > { %2757 = vmatprep.subr.bf16.mxu0 %v3555_v25  ;;  %v4035_v25 = vld [vmem:[#allocation10 + $0xe8] ss:$16 sps:$4 sm:$0xff]  }
 0x163   : > { %2758 = vmatpush1.bf16.msra.mxu0 %v3554_v26 }
 0x164   : > { %2759 = vmatprep.subr.bf16.mxu0 %v3563_v29 }
 0x167   : > { %2760 = vmatpush1.bf16.msra.mxu0 %v3562_v30 }
 0x168   : > { %2761 = vmatprep.subr.bf16.mxu0 %v3571_v33  ;;  %v1172_v33 = vld [vmem:[#allocation11 + $0x68] sm:$0xff] }
 0x169   : > { %v3485_v40 = vcombine.high %v1168_v32, %v1172_v33 }
 0x16b   : > { %2762 = vmatpush1.bf16.msra.mxu0 %v3570_v34 }
 0x16c   : > { %2763 = vmatprep.subr.bf16.mxu0 %v3579_v37  ;;  %v3476_v37 = vcombine.low %v1160_v20, %v1164_v21 }
 0x16f   : > { %2764 = vmatpush1.bf16.msra.mxu0 %v3578_v38 }
 0x170   : > { %2765 = vmatprep.subr.bf16.mxu0 %v3587_v42  ;;  %v1295_v42 = vld [vmem:[#allocation11 + $0x440] sm:$0xff] }
 0x173   : > { %2766 = vmatpush1.bf16.msra.mxu0 %v3586_v43  ;;  %v1299_v43 = vld [vmem:[#allocation11 + $0x460] sm:$0xff] }
 0x174   : > { %2767 = vmatprep.subr.bf16.mxu0 %v3595_v46 }
 0x177   : > { %2768 = vmatpush1.bf16.msra.mxu0 %v3594_v47  ;;  %v3484_v47 = vcombine.low %v1168_v32, %v1172_v33  ;;  %v1236_v32 = vld [vmem:[#allocation11 + $0x268] sm:$0xff] }
 0x178   : > { %2780 = vmatprep.subr.bf16.mxu0 %v3603_v51  ;;  %v3611_v51 = vcombine.high %v1295_v42, %v1299_v43 }
 0x1ed   : > { %v661_v53 = vpop.f32.mrb[0].mxu0 }
 0x1ee   : > { %v662_v54 = vadd.f32 %v3415_v52, %v661_v53  ;;  %v3789_v55 = vpop.f32.mrb[1].mxu0  ;;  %v1303_v53 = vld [vmem:[#allocation11 + $0x480] sm:$0xff] }
 0x1ef   : > { %v664_v56 = vpop.f32.mrb[2].mxu0  ;;  %v1184_v55 = vld [vmem:[#allocation11 + $0xc8] sm:$0xff] }
 0x1f0   : > { %v665_v57 = vadd.f32 %v3415_v52, %v664_v56  ;;  %v3790_v58 = vpop.f32.mrb[3].mxu0  ;;  %v668_v59 = vmax.f32 %v662_v54, 0.0  ;;  %v3493_v52 = vcombine.high %v1176_v44, %v1180_v45  ;;  %v1307_v54 = vld [vmem:[#allocation11 + $0x4a0] sm:$0xff]  ;;  %v1188_v56 = vld [vmem:[#allocation11 + $0xe8] sm:$0xff] }
 0x1f1   : > { %v3619_v58 = vcombine.high %v1303_v53, %v1307_v54 }
 0x1f2   : > { %v669_v60 = vmax.f32 %v665_v57, 0.0  ;;  %v3492_v57 = vcombine.low %v1176_v44, %v1180_v45  ;;  %v1256_v45 = vld [vmem:[#allocation11 + $0x308] sm:$0xff] }
 0x1f4   : > { %v670_v62 = vpack.c.bf16 %v669_v60, %v668_v59  ;;  %v3501_v59 = vcombine.high %v1184_v55, %v1188_v56  ;;  %v1311_v60 = vld [vmem:[#allocation11 + $0x4c0] sm:$0xff] }
 0x1f6   : > { %812 = vmatmul.mubr.bf16.vlgmr.msra.gmra.mrb[0].mxu1 %v670_v62  ;;  %v1192_v62 = vld [vmem:[#allocation11 + $0x108] sm:$0xff] }
 0x1f7   : > { %1105 = vmatpush1.bf16.msra.mxu1 %v4014_v61  ;;  %1136 = vmatprep.mubr.bf16.mxu1 %v4345_v1  ;;  %v4029_v1 = vld [vmem:[#allocation10 + $0xa8] ss:$16 sps:$4 sm:$0xff]   ;;  %v1315_v61 = vld [vmem:[#allocation11 + $0x4e0] sm:$0xff] }
 0x1f8   : > { %1106 = vmatprep.subr.bf16.mxu1 %v4019_v63  ;;  %v1196_v63 = vld [vmem:[#allocation11 + $0x128] sm:$0xff] }
 0x1f9   : > { %v3509_v48 = vcombine.high %v1192_v62, %v1196_v63 }
 0x1fb   : > { %1107 = vmatpush1.bf16.msra.mxu1 %v4017_v2  ;;  %v3618_v2 = vcombine.low %v1303_v53, %v1307_v54  ;;  %v1264_v53 = vld [vmem:[#allocation11 + $0x348] sm:$0xff] }
 0x1fc   : > { %1108 = vmatprep.subr.bf16.mxu1 %v4022_v3  ;;  %v3500_v3 = vcombine.low %v1184_v55, %v1188_v56  ;;  %v1268_v54 = vld [vmem:[#allocation11 + $0x368] sm:$0xff] }
 0x1fd   : > { %v3581_v56 = vcombine.high %v1264_v53, %v1268_v54 }
 0x1ff   : > { %1109 = vmatpush1.bf16.msra.mxu1 %v4020_v4  ;;  %v3627_v4 = vcombine.high %v1311_v60, %v1315_v61 }
 0x200   : > { %1110 = vmatprep.subr.bf16.mxu1 %v4025_v5  ;;  %v1200_v5 = vld [vmem:[#allocation11 + $0x148] sm:$0xff] }
 0x203   : > { %1111 = vmatpush1.bf16.msra.mxu1 %v4023_v7  ;;  %v3626_v7 = vcombine.low %v1311_v60, %v1315_v61  ;;  %v1335_v60 = vld [vmem:[#allocation11 + $0x580] sm:$0xff] }
 0x204   : > { %1112 = vmatprep.subr.bf16.mxu1 %v4028_v8  ;;  %v3508_v8 = vcombine.low %v1192_v62, %v1196_v63  ;;  %v1339_v61 = vld [vmem:[#allocation11 + $0x5a0] sm:$0xff]  ;;  %v1280_v62 = vld [vmem:[#allocation11 + $0x3c8] sm:$0xff] }
 0x205   : > { %v1284_v63 = vld [vmem:[#allocation11 + $0x3e8] sm:$0xff] }
 0x207   : > { %1113 = vmatpush1.bf16.msra.mxu1 %v4026_v10 }
 0x208   : > { %1114 = vmatprep.subr.bf16.mxu1 %v4031_v11  ;;  %v3517_v11 = vcombine.high %v1200_v5, %v1204_v6 }
 0x20b   : > { %1115 = vmatpush1.bf16.msra.mxu1 %v4029_v1  ;;  %v1327_v1 = vld [vmem:[#allocation11 + $0x540] sm:$0xff] }
 0x20c   : > { %1116 = vmatprep.subr.bf16.mxu1 %v4034_v15  ;;  %v1331_v15 = vld [vmem:[#allocation11 + $0x560] sm:$0xff] }
 0x20d   : > { %v1095_v22 = vpop.f32.mrb[4].mxu0  ;;  %v3643_v20 = vcombine.high %v1327_v1, %v1331_v15 }
 0x20e   : > { %v1096_v23 = vadd.f32 %v1095_v22, %v878_v16  ;;  %v1097_v24 = vpop.f32.mrb[5].mxu0  ;;  %v1216_v22 = vld [vmem:[#allocation11 + $0x1c8] sm:$0xff] }
 0x20f   : > { %1117 = vmatpush1.bf16.msra.mxu1 %v4032_v17  ;;  %v1098_v26 = vadd.f32 %v1097_v24, %v882_v18  ;;  %v1099_v27 = vpop.f32.mrb[6].mxu0  ;;  %v1212_v17 = vld [vmem:[#allocation11 + $0x1a8] sm:$0xff]  ;;  %v3642_v24 = vcombine.low %v1327_v1, %v1331_v15  ;;  %v1351_v1 = vld [vmem:[#allocation11 + $0x600] sm:$0xff] }
 0x210   : > { %1118 = vmatprep.subr.bf16.mxu1 %v4037_v19  ;;  %v1147_v29 = vmax.f32 %v1096_v23, 0.0  ;;  %v1100_v30 = vadd.f32 %v1099_v27, %v878_v16  ;;  %v1101_v31 = vpop.f32.mrb[7].mxu0  ;;  %v1208_v16 = vld [vmem:[#allocation11 + $0x188] sm:$0xff]  ;;  %v3516_v19 = vcombine.low %v1200_v5, %v1204_v6  ;;  %v1355_v15 = vld [vmem:[#allocation11 + $0x620] sm:$0xff] }
 0x211   : > { %v1148_v34 = vmax.f32 %v1098_v26, 0.0  ;;  %v1102_v35 = vadd.f32 %v1101_v31, %v882_v18  ;;  %v3525_v21 = vcombine.high %v1208_v16, %v1212_v17  ;;  %v1220_v23 = vld [vmem:[#allocation11 + $0x1e8] sm:$0xff] }
 0x212   : > { %v1151_v36 = vmax.f32 %v1100_v30, 0.0  ;;  %v3533_v26 = vcombine.high %v1216_v22, %v1220_v23  ;;  %v1224_v27 = vld [vmem:[#allocation11 + $0x208] sm:$0xff] }
 0x213   : > { %1119 = vmatpush1.bf16.msra.mxu1 %v4035_v25  ;;  %v1152_v38 = vmax.f32 %v1102_v35, 0.0  ;;  %v3524_v25 = vcombine.low %v1208_v16, %v1212_v17  ;;  %v1232_v31 = vld [vmem:[#allocation11 + $0x248] sm:$0xff] }
 0x214   : > { %2823 = vmatprep.subr.bf16.mxu1 %v3477_v28  ;;  %v4769_v41 = vpack.c.bf16 %v1151_v36, %v1147_v29  ;;  %v1228_v28 = vld [vmem:[#allocation11 + $0x228] sm:$0xff]  ;;  %v3532_v29 = vcombine.low %v1216_v22, %v1220_v23  ;;  %v1359_v23 = vld [vmem:[#allocation11 + $0x640] sm:$0xff] }
 0x215   : > { %v4771_v46 = vpack.c.bf16 %v1152_v38, %v1148_v34  ;;  %v3541_v30 = vcombine.high %v1224_v27, %v1228_v28  ;;  %v3540_v33 = vcombine.low %v1224_v27, %v1228_v28  ;;  %v3549_v34 = vcombine.high %v1232_v31, %v1236_v32  ;;  %v1240_v35 = vld [vmem:[#allocation11 + $0x288] sm:$0xff]  ;;  %v1367_v28 = vld [vmem:[#allocation11 + $0x680] sm:$0xff] }
 0x216   : > { %1137 = vmatmul.mubr.bf16.vlgmr.msra.gmra.mrb[4].mxu1 %v4737_v39  ;;  %v3610_v39 = vcombine.low %v1295_v42, %v1299_v43  ;;  %v1244_v36 = vld [vmem:[#allocation11 + $0x2a8] sm:$0xff] }
 0x217   : > { %2824 = vmatpush1.bf16.msra.mxu1 %v3476_v37  ;;  %2769 = vmatprep.mubr.bf16.mxu0 %v4771_v46  ;;  %v3548_v37 = vcombine.low %v1232_v31, %v1236_v32  ;;  %v3557_v38 = vcombine.high %v1240_v35, %v1244_v36  ;;  %v1252_v42 = vld [vmem:[#allocation11 + $0x2e8] sm:$0xff]  ;;  %v3556_v43 = vcombine.low %v1240_v35, %v1244_v36  ;;  %v1375_v31 = vld [vmem:[#allocation11 + $0x6c0] sm:$0xff] }
 0x218   : > { %2825 = vmatprep.subr.bf16.mxu1 %v3485_v40  ;;  %2855 = vmatprep.mubr.bf16.mxu1 %v4771_v46  ;;  %v1248_v40 = vld [vmem:[#allocation11 + $0x2c8] sm:$0xff] }
 0x219   : > { %2770 = vmatmul.mubr.bf16.vlgmr.msra.gmra.mrb[8].mxu0 %v4769_v41  ;;  %v3565_v44 = vcombine.high %v1248_v40, %v1252_v42  ;;  %v1288_v5 = vld [vmem:[#allocation11 + $0x408] sm:$0xff] }
 0x21a   : > { %2781 = vmatpush1.bf16.msra.mxu0 %v3602_v50  ;;  %v1323_v50 = vld [vmem:[#allocation11 + $0x520] sm:$0xff]  ;;  %v1292_v6 = vld [vmem:[#allocation11 + $0x428] sm:$0xff] }
 0x21b   : > { %2826 = vmatpush1.bf16.msra.mxu1 %v3484_v47  ;;  %2782 = vmatprep.subr.bf16.mxu0 %v3611_v51  ;;  %v3635_v10 = vcombine.high %v1319_v49, %v1323_v50  ;;  %v3634_v18 = vcombine.low %v1319_v49, %v1323_v50  ;;  %v1260_v47 = vld [vmem:[#allocation11 + $0x328] sm:$0xff]  ;;  %v3564_v51 = vcombine.low %v1248_v40, %v1252_v42  ;;  %v1343_v49 = vld [vmem:[#allocation11 + $0x5c0] sm:$0xff] }
 0x21c   : > { %2827 = vmatprep.subr.bf16.mxu1 %v3493_v52  ;;  %v3573_v52 = vcombine.high %v1256_v45, %v1260_v47  ;;  %v3572_v55 = vcombine.low %v1256_v45, %v1260_v47  ;;  %v1347_v50 = vld [vmem:[#allocation11 + $0x5e0] sm:$0xff]  ;;  %v1296_v16 = vld [vmem:[#allocation11 + $0x448] sm:$0xff] }
 0x21d   : > { %v1300_v17 = vld [vmem:[#allocation11 + $0x468] sm:$0xff]  ;;  %v1383_v40 = vld [vmem:[#allocation11 + $0x700] sm:$0xff] }
 0x21e   : > { %2783 = vmatpush1.bf16.msra.mxu0 %v3610_v39  ;;  %v1272_v39 = vld [vmem:[#allocation11 + $0x388] sm:$0xff]  ;;  %v3612_v32 = vcombine.low %v1296_v16, %v1300_v17  ;;  %v1387_v42 = vld [vmem:[#allocation11 + $0x720] sm:$0xff] }
 0x21f   : > { %2828 = vmatpush1.bf16.msra.mxu1 %v3492_v57  ;;  %2784 = vmatprep.subr.bf16.mxu0 %v3619_v58  ;;  %v1276_v57 = vld [vmem:[#allocation11 + $0x3a8] sm:$0xff]  ;;  %v3580_v58 = vcombine.low %v1264_v53, %v1268_v54  ;;  %v1391_v53 = vld [vmem:[#allocation11 + $0x740] sm:$0xff] }
 0x220   : > { %2829 = vmatprep.subr.bf16.mxu1 %v3501_v59  ;;  %v3589_v59 = vcombine.high %v1272_v39, %v1276_v57  ;;  %v1304_v22 = vld [vmem:[#allocation11 + $0x488] sm:$0xff]  ;;  %v1395_v54 = vld [vmem:[#allocation11 + $0x760] sm:$0xff] }
 0x221   : > { %v1312_v36 = vld [vmem:[#allocation11 + $0x4c8] sm:$0xff] }
 0x222   : > { %2785 = vmatpush1.bf16.msra.mxu0 %v3618_v2  ;;  %v3651_v2 = vcombine.high %v1335_v60, %v1339_v61  ;;  %v1320_v47 = vld [vmem:[#allocation11 + $0x508] sm:$0xff] }
 0x223   : > { %2830 = vmatpush1.bf16.msra.mxu1 %v3500_v3  ;;  %2786 = vmatprep.subr.bf16.mxu0 %v3627_v4  ;;  %v3650_v3 = vcombine.low %v1335_v60, %v1339_v61  ;;  %v3588_v4 = vcombine.low %v1272_v39, %v1276_v57  ;;  %v3698_v39 = vcombine.low %v1383_v40, %v1387_v42  ;;  %v1328_v57 = vld [vmem:[#allocation11 + $0x548] sm:$0xff] }
 0x224   : > { %2831 = vmatprep.subr.bf16.mxu1 %v3509_v48  ;;  %v3597_v48 = vcombine.high %v1280_v62, %v1284_v63 }
 0x226   : > { %2787 = vmatpush1.bf16.msra.mxu0 %v3626_v7  ;;  %v3659_v7 = vcombine.high %v1343_v49, %v1347_v50 }
 0x227   : > { %2832 = vmatpush1.bf16.msra.mxu1 %v3508_v8  ;;  %2788 = vmatprep.subr.bf16.mxu0 %v3635_v10  ;;  %v3658_v8 = vcombine.low %v1343_v49, %v1347_v50  ;;  %v3596_v10 = vcombine.low %v1280_v62, %v1284_v63  ;;  %v3706_v62 = vcombine.low %v1391_v53, %v1395_v54  ;;  %v1336_v63 = vld [vmem:[#allocation11 + $0x588] sm:$0xff]  ;;  %v1403_v49 = vld [vmem:[#allocation11 + $0x7a0] sm:$0xff] }
 0x228   : > { %2833 = vmatprep.subr.bf16.mxu1 %v3517_v11  ;;  %v3605_v11 = vcombine.high %v1288_v5, %v1292_v6  ;;  %v1344_v50 = vld [vmem:[#allocation11 + $0x5c8] sm:$0xff] }
 0x22a   : > { %2789 = vmatpush1.bf16.msra.mxu0 %v3634_v18  ;;  %v3666_v18 = vcombine.low %v1351_v1, %v1355_v15 }
 0x22b   : > { %2834 = vmatpush1.bf16.msra.mxu1 %v3516_v19  ;;  %2790 = vmatprep.subr.bf16.mxu0 %v3643_v20  ;;  %v3667_v19 = vcombine.high %v1351_v1, %v1355_v15  ;;  %v3604_v20 = vcombine.low %v1288_v5, %v1292_v6  ;;  %v1348_v5 = vld [vmem:[#allocation11 + $0x5e8] sm:$0xff]  ;;  %v1411_v1 = vld [vmem:[#allocation11 + $0x7e0] sm:$0xff] }
 0x22c   : > { %2835 = vmatprep.subr.bf16.mxu1 %v3525_v21  ;;  %v3613_v21 = vcombine.high %v1296_v16, %v1300_v17  ;;  %v1352_v15 = vld [vmem:[#allocation11 + $0x608] sm:$0xff] }
 0x22d   : > { %v1356_v16 = vld [vmem:[#allocation11 + $0x628] sm:$0xff] }
 0x22e   : > { %2791 = vmatpush1.bf16.msra.mxu0 %v3642_v24  ;;  %v1363_v24 = vld [vmem:[#allocation11 + $0x660] sm:$0xff] }
 0x22f   : > { %2836 = vmatpush1.bf16.msra.mxu1 %v3524_v25  ;;  %2792 = vmatprep.subr.bf16.mxu0 %v3651_v2  ;;  %v1308_v25 = vld [vmem:[#allocation11 + $0x4a8] sm:$0xff]  ;;  %v3675_v27 = vcombine.high %v1359_v23, %v1363_v24 }
 0x230   : > { %2837 = vmatprep.subr.bf16.mxu1 %v3533_v26  ;;  %v3674_v26 = vcombine.low %v1359_v23, %v1363_v24  ;;  %v1340_v2 = vld [vmem:[#allocation11 + $0x5a8] sm:$0xff]  ;;  %v4785_v23 = vld [vmem:[#allocation11 + $0x18] sm:$0xff] }
 0x231   : > { %v1360_v24 = vld [vmem:[#allocation11 + $0x648] sm:$0xff] }
 0x232   : > { %2793 = vmatpush1.bf16.msra.mxu0 %v3650_v3 }
 0x233   : > { %2838 = vmatpush1.bf16.msra.mxu1 %v3532_v29  ;;  %2794 = vmatprep.subr.bf16.mxu0 %v3659_v7  ;;  %v1371_v29 = vld [vmem:[#allocation11 + $0x6a0] sm:$0xff] }
 0x234   : > { %2839 = vmatprep.subr.bf16.mxu1 %v3541_v30  ;;  %v3683_v30 = vcombine.high %v1367_v28, %v1371_v29  ;;  %v3682_v35 = vcombine.low %v1367_v28, %v1371_v29 }
 0x236   : > { %2795 = vmatpush1.bf16.msra.mxu0 %v3658_v8  ;;  %v3652_v8 = vcombine.low %v1336_v63, %v1340_v2 }
 0x237   : > { %2840 = vmatpush1.bf16.msra.mxu1 %v3540_v33  ;;  %2796 = vmatprep.subr.bf16.mxu0 %v3667_v19  ;;  %v1379_v33 = vld [vmem:[#allocation11 + $0x6e0] sm:$0xff]  ;;  %v3660_v19 = vcombine.low %v1344_v50, %v1348_v5 }
 0x238   : > { %2841 = vmatprep.subr.bf16.mxu1 %v3549_v34  ;;  %v3621_v34 = vcombine.high %v1304_v22, %v1308_v25  ;;  %v3690_v45 = vcombine.low %v1375_v31, %v1379_v33 }
 0x23a   : > { %2797 = vmatpush1.bf16.msra.mxu0 %v3666_v18 }
 0x23b   : > { %2842 = vmatpush1.bf16.msra.mxu1 %v3548_v37  ;;  %2798 = vmatprep.subr.bf16.mxu0 %v3675_v27  ;;  %v1316_v37 = vld [vmem:[#allocation11 + $0x4e8] sm:$0xff]  ;;  %v4789_v27 = vld [vmem:[#allocation11 + $0x38] sm:$0xff] }
 0x23c   : > { %2843 = vmatprep.subr.bf16.mxu1 %v3557_v38  ;;  %v3691_v38 = vcombine.high %v1375_v31, %v1379_v33  ;;  %v3480_v29 = vcombine.low %v4785_v23, %v4789_v27  ;;  %v1372_v33 = vld [vmem:[#allocation11 + $0x6a8] sm:$0xff] }
 0x23e   : > { %2799 = vmatpush1.bf16.msra.mxu0 %v3674_v26 }
 0x23f   : > { %2844 = vmatpush1.bf16.msra.mxu1 %v3556_v43  ;;  %2800 = vmatprep.subr.bf16.mxu0 %v3683_v30  ;;  %v3620_v43 = vcombine.low %v1304_v22, %v1308_v25  ;;  %v4783_v22 = vld [vmem:[#allocation11 + $0x30] sm:$0xff]  ;;  %v1364_v25 = vld [vmem:[#allocation11 + $0x668] sm:$0xff]  ;;  %v3668_v30 = vcombine.low %v1352_v15, %v1356_v16 }
 0x240   : > { %2845 = vmatprep.subr.bf16.mxu1 %v3565_v44  ;;  %v3629_v44 = vcombine.high %v1312_v36, %v1316_v37  ;;  %v3677_v31 = vcombine.high %v1360_v24, %v1364_v25 }
 0x242   : > { %2801 = vmatpush1.bf16.msra.mxu0 %v3682_v35 }
 0x243   : > { %2846 = vmatpush1.bf16.msra.mxu1 %v3564_v51  ;;  %v1324_v51 = vld [vmem:[#allocation11 + $0x528] sm:$0xff]  ;;  %2802 = vmatprep.subr.bf16.mxu0 %v3691_v38 }
 0x244   : > { %2847 = vmatprep.subr.bf16.mxu1 %v3573_v52  ;;  %v3699_v52 = vcombine.high %v1383_v40, %v1387_v42  ;;  %v3636_v60 = vcombine.low %v1320_v47, %v1324_v51  ;;  %v1384_v42 = vld [vmem:[#allocation11 + $0x708] sm:$0xff] }
 0x246   : > { %2803 = vmatpush1.bf16.msra.mxu0 %v3690_v45 }
 0x247   : > { %2848 = vmatpush1.bf16.msra.mxu1 %v3572_v55  ;;  %v3628_v55 = vcombine.low %v1312_v36, %v1316_v37  ;;  %2804 = vmatprep.subr.bf16.mxu0 %v3699_v52  ;;  %v1376_v36 = vld [vmem:[#allocation11 + $0x6c8] sm:$0xff] }
 0x248   : > { %2849 = vmatprep.subr.bf16.mxu1 %v3581_v56  ;;  %v3637_v56 = vcombine.high %v1320_v47, %v1324_v51  ;;  %v1380_v37 = vld [vmem:[#allocation11 + $0x6e8] sm:$0xff] }
 0x249   : > { %v3693_v40 = vcombine.high %v1376_v36, %v1380_v37  ;;  %v1392_v47 = vld [vmem:[#allocation11 + $0x748] sm:$0xff] }
 0x24a   : > { %2805 = vmatpush1.bf16.msra.mxu0 %v3698_v39  ;;  %v1396_v51 = vld [vmem:[#allocation11 + $0x768] sm:$0xff] }
 0x24b   : > { %2850 = vmatpush1.bf16.msra.mxu1 %v3580_v58  ;;  %v1332_v58 = vld [vmem:[#allocation11 + $0x568] sm:$0xff] }
 0x24c   : > { %2851 = vmatprep.subr.bf16.mxu1 %v3589_v59  ;;  %v3707_v59 = vcombine.high %v1391_v53, %v1395_v54  ;;  %v3645_v61 = vcombine.high %v1328_v57, %v1332_v58  ;;  %v3644_v3 = vcombine.low %v1328_v57, %v1332_v58  ;;  %v3709_v53 = vcombine.high %v1392_v47, %v1396_v51  ;;  %v1400_v54 = vld [vmem:[#allocation11 + $0x788] sm:$0xff] }
 0x24d   : > { %v1408_v57 = vld [vmem:[#allocation11 + $0x7c8] sm:$0xff] }
 0x24e   : > { %2806 = vmatprep.subr.bf16.mxu0 %v3707_v59  ;;  %v1412_v58 = vld [vmem:[#allocation11 + $0x7e8] sm:$0xff] }
 0x24f   : > { %2852 = vmatpush1.bf16.msra.mxu1 %v3588_v4  ;;  %v3653_v4 = vcombine.high %v1336_v63, %v1340_v2  ;;  %2807 = vmatpush1.bf16.msra.mxu0 %v3706_v62  ;;  %v3481_v62 = vcombine.high %v4785_v23, %v4789_v27  ;;  %v687_v63 = vld [vmem:[%s4973_s3] sm:$0x3]  ;;  %s4244_s3 = scalar_lea.vmem %s4868_s11, 128 }
 0x250   : > { %2853 = vmatprep.subr.bf16.mxu1 %v3597_v48  ;;  %v1399_v48 = vld [vmem:[#allocation11 + $0x780] sm:$0xff]  ;;  %v692_v2 = vrot.slane %v687_v63, %v4755_v12  ;;  %p4245_p2 = scmp.ne.s32.totalorder %s4868_s11, %s4244_s3 }
 0x251   : > { %v3715_v6 = vcombine.high %v1399_v48, %v1403_v49  ;;  %v3714_v7 = vcombine.low %v1399_v48, %v1403_v49 }
 0x252   : > { %p4246_p5 = pnand %p4245_p2, %p4977_p13 }
 0x253   : > { %2854 = vmatpush1.bf16.msra.mxu1 %v3596_v10  ;;  %2808 = vmatprep.subr.bf16.mxu0 %v3715_v6  ;;  %v3661_v10 = vcombine.high %v1344_v50, %v1348_v5 }
 0x254   : > { %2866 = vmatprep.subr.bf16.mxu1 %v3605_v11  ;;  %2809 = vmatpush1.bf16.msra.mxu0 %v3714_v7  ;;  %v1407_v11 = vld [vmem:[#allocation11 + $0x7c0] sm:$0xff]  ;;  %p4247_p8 = pneg %p4246_p5 }
 0x255   : > { %v3723_v17 = vcombine.high %v1407_v11, %v1411_v1  ;;  %v3722_v18 = vcombine.low %v1407_v11, %v1411_v1 }
 0x256   : > { %2856 = vmatmul.mubr.bf16.vlgmr.msra.gmra.mrb[8].mxu1 %v4769_v41 }
 0x257   : > { %2867 = vmatpush1.bf16.msra.mxu1 %v3604_v20  ;;  %2810 = vmatprep.subr.bf16.mxu0 %v3723_v17  ;;  %v3669_v20 = vcombine.high %v1352_v15, %v1356_v16 }
 0x258   : > { %2868 = vmatprep.subr.bf16.mxu1 %v3613_v21  ;;  %2811 = vmatpush1.bf16.msra.mxu0 %v3722_v18  ;;  %v4781_v21 = vld [vmem:[#allocation11 + $0x10] sm:$0xff] }
 0x259   : > { %v3479_v26 = vcombine.high %v4781_v21, %v4783_v22  ;;  %v3478_v28 = vcombine.low %v4781_v21, %v4783_v22 }
 0x25b   : > { %2869 = vmatpush1.bf16.msra.mxu1 %v3612_v32  ;;  %2909 = vmatprep.subr.bf16.mxu0 %v3479_v26  ;;  %v1368_v32 = vld [vmem:[#allocation11 + $0x688] sm:$0xff] }
 0x25c   : > { %2870 = vmatprep.subr.bf16.mxu1 %v3621_v34  ;;  %v3676_v34 = vcombine.low %v1360_v24, %v1364_v25  ;;  %v3685_v35 = vcombine.high %v1368_v32, %v1372_v33  ;;  %v3684_v38 = vcombine.low %v1368_v32, %v1372_v33 }
 0x25f   : > { %2871 = vmatpush1.bf16.msra.mxu1 %v3620_v43  ;;  %v1388_v43 = vld [vmem:[#allocation11 + $0x728] sm:$0xff] }
 0x260   : > { %2872 = vmatprep.subr.bf16.mxu1 %v3629_v44  ;;  %v3692_v44 = vcombine.low %v1376_v36, %v1380_v37  ;;  %v3701_v45 = vcombine.high %v1384_v42, %v1388_v43  ;;  %v3700_v52 = vcombine.low %v1384_v42, %v1388_v43  ;;  %v1169_v43 = vld [vmem:[#allocation11 + $0x50] sm:$0xff] }
 0x263   : > { %2873 = vmatpush1.bf16.msra.mxu1 %v3628_v55  ;;  %v1404_v55 = vld [vmem:[#allocation11 + $0x7a8] sm:$0xff] }
 0x264   : > { %2874 = vmatprep.subr.bf16.mxu1 %v3637_v56  ;;  %v3708_v56 = vcombine.low %v1392_v47, %v1396_v51  ;;  %v3717_v39 = vcombine.high %v1400_v54, %v1404_v55  ;;  %v3716_v59 = vcombine.low %v1400_v54, %v1404_v55  ;;  %v1170_v47 = vld [vmem:[#allocation11 + $0x58] sm:$0xff]  ;;  %v1181_v55 = vld [vmem:[#allocation11 + $0xb0] sm:$0xff] }
 0x265   : > { %v1174_v51 = vld [vmem:[#allocation11 + $0x78] sm:$0xff] }
 0x266   : > { %v3489_v54 = vcombine.high %v1170_v47, %v1174_v51 }
 0x267   : > { %2875 = vmatpush1.bf16.msra.mxu1 %v3636_v60  ;;  %v3725_v60 = vcombine.high %v1408_v57, %v1412_v58 }
 0x268   : > { %2876 = vmatprep.subr.bf16.mxu1 %v3645_v61  ;;  %v3724_v61 = vcombine.low %v1408_v57, %v1412_v58  ;;  %v3488_v58 = vcombine.low %v1170_v47, %v1174_v51  ;;  %v1226_v47 = vld [vmem:[#allocation11 + $0x218] sm:$0xff] }
 0x269   : > { %v1230_v51 = vld [vmem:[#allocation11 + $0x238] sm:$0xff] }
 0x26b   : > { %2877 = vmatpush1.bf16.msra.mxu1 %v3644_v3  ;;  %v696_v3 = vrot.slane %v687_v63, %v4763_v14  ;;  %v1186_v63 = vld [vmem:[#allocation11 + $0xd8] sm:$0xff] }
 0x26c   : > { %2878 = vmatprep.subr.bf16.mxu1 %v3653_v4 }
 0x26f   : > { %2879 = vmatpush1.bf16.msra.mxu1 %v3652_v8 }
 0x270   : > { %2880 = vmatprep.subr.bf16.mxu1 %v3661_v10 }
 0x273   : > { %2881 = vmatpush1.bf16.msra.mxu1 %v3660_v19  ;;  %v885_v19 = vsub.s32 2, %v4752_v9 }
 0x274   : > { %2882 = vmatprep.subr.bf16.mxu1 %v3669_v20  ;;  %v889_v20 = vsub.s32 3, %v4752_v9 }
 0x275   : > { %v886_v24 = vrot.slane %v4760_v13, %v885_v19 }
 0x276   : > { %v890_v25 = vrot.slane %v4760_v13, %v889_v20  ;;  %v1177_v13 = vld [vmem:[#allocation11 + $0x90] sm:$0xff] }
 0x277   : > { %2883 = vmatpush1.bf16.msra.mxu1 %v3668_v30  ;;  %v3494_v21 = vcombine.low %v1177_v13, %v1181_v55 }
 0x278   : > { %2884 = vmatprep.subr.bf16.mxu1 %v3677_v31 }
 0x27b   : > { %2885 = vmatpush1.bf16.msra.mxu1 %v3676_v34 }
 0x27c   : > { %2886 = vmatprep.subr.bf16.mxu1 %v3685_v35 }
 0x27f   : > { %2887 = vmatpush1.bf16.msra.mxu1 %v3684_v38 }
 0x280   : > { %2888 = vmatprep.subr.bf16.mxu1 %v3693_v40 }
 0x283   : > { %2889 = vmatpush1.bf16.msra.mxu1 %v3692_v44 }
 0x284   : > { %2890 = vmatprep.subr.bf16.mxu1 %v3701_v45  ;;  %v1173_v45 = vld [vmem:[#allocation11 + $0x70] sm:$0xff] }
 0x285   : > { %v3486_v57 = vcombine.low %v1169_v43, %v1173_v45 }
 0x287   : > { %2891 = vmatpush1.bf16.msra.mxu1 %v3700_v52 }
 0x288   : > { %2892 = vmatprep.subr.bf16.mxu1 %v3709_v53  ;;  %v3487_v53 = vcombine.high %v1169_v43, %v1173_v45  ;;  %v1225_v43 = vld [vmem:[#allocation11 + $0x210] sm:$0xff] }
 0x289   : > { %v1229_v45 = vld [vmem:[#allocation11 + $0x230] sm:$0xff] }
 0x28b   : > { %2893 = vmatpush1.bf16.msra.mxu1 %v3708_v56  ;;  %v1178_v56 = vld [vmem:[#allocation11 + $0x98] sm:$0xff] }
 0x28c   : > { %2894 = vmatprep.subr.bf16.mxu1 %v3717_v39  ;;  %v1182_v39 = vld [vmem:[#allocation11 + $0xb8] sm:$0xff] }
 0x28d   : > { %v3496_v22 = vcombine.low %v1178_v56, %v1182_v39 }
 0x28f   : > { %2895 = vmatpush1.bf16.msra.mxu1 %v3716_v59  ;;  %v3495_v59 = vcombine.high %v1177_v13, %v1181_v55  ;;  %v3545_v55 = vcombine.high %v1226_v47, %v1230_v51 }
 0x290   : > { %2896 = vmatprep.subr.bf16.mxu1 %v3725_v60  ;;  %v3497_v60 = vcombine.high %v1178_v56, %v1182_v39  ;;  %v1233_v56 = vld [vmem:[#allocation11 + $0x250] sm:$0xff] }
 0x291   : > { %v1237_v39 = vld [vmem:[#allocation11 + $0x270] sm:$0xff] }
 0x293   : > { %2897 = vmatpush1.bf16.msra.mxu1 %v3724_v61  ;;  %v1185_v61 = vld [vmem:[#allocation11 + $0xd0] sm:$0xff] }
 0x294   : > { %2995 = vmatprep.subr.bf16.mxu1 %v3481_v62  ;;  %v1189_v62 = vld [vmem:[#allocation11 + $0xf0] sm:$0xff] }
 0x295   : > { %v3503_v23 = vcombine.high %v1185_v61, %v1189_v62 }
 0x2c9   : > { %v813_v4 = vpop.f32.mrb[0].mxu1 }
 0x2ca   : > { %v814_v48 = vadd.f32 %v813_v4, %v692_v2  ;;  %v815_v49 = vpop.f32.mrb[1].mxu1  ;;  %v3502_v4 = vcombine.low %v1185_v61, %v1189_v62  ;;  %v3551_v61 = vcombine.high %v1233_v56, %v1237_v39 }
 0x2cb   : > { %v816_v50 = vadd.f32 %v815_v49, %v696_v3  ;;  %v817_v5 = vpop.f32.mrb[2].mxu1 }
 0x2cc   : > { %v818_v6 = vadd.f32 %v817_v5, %v692_v2  ;;  %v819_v7 = vpop.f32.mrb[3].mxu1  ;;  %v822_v10 = vmax.f32 %v814_v48, 0.0  ;;  %v1190_v2 = vld [vmem:[#allocation11 + $0xf8] sm:$0xff]  ;;  %v1201_v5 = vld [vmem:[#allocation11 + $0x150] sm:$0xff] }
 0x2cd   : > { %v820_v8 = vadd.f32 %v819_v7, %v696_v3  ;;  %v823_v1 = vmax.f32 %v816_v50, 0.0  ;;  %v3505_v27 = vcombine.high %v1186_v63, %v1190_v2  ;;  %v1194_v3 = vld [vmem:[#allocation11 + $0x118] sm:$0xff]  ;;  %v3504_v48 = vcombine.low %v1186_v63, %v1190_v2  ;;  %v1241_v63 = vld [vmem:[#allocation11 + $0x290] sm:$0xff] }
 0x2ce   : > { %v824_v11 = vmax.f32 %v818_v6, 0.0  ;;  %v1205_v6 = vld [vmem:[#allocation11 + $0x170] sm:$0xff]  ;;  %v1202_v7 = vld [vmem:[#allocation11 + $0x158] sm:$0xff] }
 0x2cf   : > { %v825_v15 = vmax.f32 %v820_v8, 0.0  ;;  %v1206_v8 = vld [vmem:[#allocation11 + $0x178] sm:$0xff]  ;;  %v1245_v2 = vld [vmem:[#allocation11 + $0x2b0] sm:$0xff] }
 0x2d0   : > { %v826_v16 = vpack.c.bf16 %v824_v11, %v822_v10 }
 0x2d1   : > { %v827_v17 = vpack.c.bf16 %v825_v15, %v823_v1  ;;  %v3519_v1 = vcombine.high %v1201_v5, %v1205_v6  ;;  %v3521_v15 = vcombine.high %v1202_v7, %v1206_v8 }
 0x2d3   : > { %v4802_v18 = vmax.bf16 %v827_v17, %v826_v16  ;;  %v1209_v16 = vld [vmem:[#allocation11 + $0x190] sm:$0xff] }
 0x2d4   : > { %v1213_v17 = vld [vmem:[#allocation11 + $0x1b0] sm:$0xff] }
 0x2d5   : > { %830 = vrot.lane.b32.xlu0 %v4802_v18, %s4346_s8 }
 0x2e9   : > { %v1138_v26 = vpop.f32.mrb[4].mxu1 }
 0x2ea   : > { %v1139_v30 = vadd.f32 %v1138_v26, %v886_v24  ;;  %v1140_v31 = vpop.f32.mrb[5].mxu1  ;;  %v3518_v26 = vcombine.low %v1201_v5, %v1205_v6 }
 0x2eb   : > { %v1141_v32 = vadd.f32 %v1140_v31, %v890_v25  ;;  %v1142_v33 = vpop.f32.mrb[6].mxu1  ;;  %v3527_v31 = vcombine.high %v1209_v16, %v1213_v17 }
 0x2ec   : > { %v1143_v34 = vadd.f32 %v1142_v33, %v886_v24  ;;  %v1144_v35 = vpop.f32.mrb[7].mxu1  ;;  %v1149_v37 = vmax.f32 %v1139_v30, 0.0  ;;  %v1210_v24 = vld [vmem:[#allocation11 + $0x198] sm:$0xff]  ;;  %v3520_v30 = vcombine.low %v1202_v7, %v1206_v8  ;;  %v1217_v33 = vld [vmem:[#allocation11 + $0x1d0] sm:$0xff] }
 0x2ed   : > { %v1145_v36 = vadd.f32 %v1144_v35, %v890_v25  ;;  %v1150_v40 = vmax.f32 %v1141_v32, 0.0  ;;  %v1214_v25 = vld [vmem:[#allocation11 + $0x1b8] sm:$0xff]  ;;  %v1257_v7 = vld [vmem:[#allocation11 + $0x310] sm:$0xff] }
 0x2ee   : > { %v1153_v38 = vmax.f32 %v1143_v34, 0.0  ;;  %v3529_v32 = vcombine.high %v1210_v24, %v1214_v25  ;;  %v1221_v34 = vld [vmem:[#allocation11 + $0x1f0] sm:$0xff]  ;;  %v1218_v35 = vld [vmem:[#allocation11 + $0x1d8] sm:$0xff] }
 0x2ef   : > { %v1154_v42 = vmax.f32 %v1145_v36, 0.0  ;;  %v1222_v36 = vld [vmem:[#allocation11 + $0x1f8] sm:$0xff]  ;;  %v3534_v13 = vcombine.low %v1217_v33, %v1221_v34  ;;  %v1261_v8 = vld [vmem:[#allocation11 + $0x330] sm:$0xff] }
 0x2f0   : > { %v4814_v44 = vpack.c.bf16 %v1153_v38, %v1149_v37  ;;  %v3526_v37 = vcombine.low %v1209_v16, %v1213_v17  ;;  %v3528_v38 = vcombine.low %v1210_v24, %v1214_v25  ;;  %v3575_v16 = vcombine.high %v1257_v7, %v1261_v8  ;;  %v1265_v24 = vld [vmem:[#allocation11 + $0x350] sm:$0xff] }
 0x2f1   : > { %v4816_v52 = vpack.c.bf16 %v1154_v42, %v1150_v40  ;;  %v3535_v40 = vcombine.high %v1217_v33, %v1221_v34  ;;  %v3537_v42 = vcombine.high %v1218_v35, %v1222_v36  ;;  %v1269_v25 = vld [vmem:[#allocation11 + $0x370] sm:$0xff] }
 0x2f2   : > { %v3583_v33 = vcombine.high %v1265_v24, %v1269_v25 }
 0x2f3   : > { %2812 = vmatprep.mubr.bf16.mxu0 %v4816_v52  ;;  %2898 = vmatprep.mubr.bf16.mxu1 %v4816_v52 }
 0x2f4   : > { %2813 = vmatmul.mubr.bf16.vlgmr.msra.gmra.mrb[8].mxu0 %v4814_v44  ;;  %2899 = vmatmul.mubr.bf16.vlgmr.msra.gmra.mrb[8].mxu1 %v4814_v44 }
 0x2f5   : > { %2910 = vmatpush1.bf16.msra.mxu0 %v3478_v28  ;;  %2996 = vmatpush1.bf16.msra.mxu1 %v3480_v29  ;;  %v1193_v28 = vld [vmem:[#allocation11 + $0x110] sm:$0xff] }
 0x2f6   : > { %2941 = vmatprep.mubr.bf16.mxu0 %v4771_v46  ;;  %3027 = vmatprep.mubr.bf16.mxu1 %v4771_v46  ;;  %v1197_v29 = vld [vmem:[#allocation11 + $0x130] sm:$0xff]  ;;  %v1198_v46 = vld [vmem:[#allocation11 + $0x138] sm:$0xff] }
 0x2f7   : > { %2911 = vmatprep.subr.bf16.mxu0 %v3487_v53  ;;  %2997 = vmatprep.subr.bf16.mxu1 %v3489_v54  ;;  %v3511_v49 = vcombine.high %v1193_v28, %v1197_v29  ;;  %v3513_v50 = vcombine.high %v1194_v3, %v1198_v46  ;;  %v3510_v10 = vcombine.low %v1193_v28, %v1197_v29 }
 0x2f8   : > { %v3512_v11 = vcombine.low %v1194_v3, %v1198_v46  ;;  %v3536_v53 = vcombine.low %v1218_v35, %v1222_v36  ;;  %v3543_v54 = vcombine.high %v1225_v43, %v1229_v45  ;;  %v3559_v28 = vcombine.high %v1241_v63, %v1245_v2  ;;  %v1249_v3 = vld [vmem:[#allocation11 + $0x2d0] sm:$0xff] }
 0x2f9   : > { %2912 = vmatpush1.bf16.msra.mxu0 %v3486_v57  ;;  %2998 = vmatpush1.bf16.msra.mxu1 %v3488_v58  ;;  %v1234_v57 = vld [vmem:[#allocation11 + $0x258] sm:$0xff]  ;;  %v1253_v46 = vld [vmem:[#allocation11 + $0x2f0] sm:$0xff] }
 0x2fa   : > { %2913 = vmatprep.subr.bf16.mxu0 %v3495_v59  ;;  %2999 = vmatprep.subr.bf16.mxu1 %v3497_v60  ;;  %v1238_v58 = vld [vmem:[#allocation11 + $0x278] sm:$0xff]  ;;  %v3542_v59 = vcombine.low %v1225_v43, %v1229_v45  ;;  %v3544_v60 = vcombine.low %v1226_v47, %v1230_v51  ;;  %v3567_v5 = vcombine.high %v1249_v3, %v1253_v46  ;;  %v1273_v35 = vld [vmem:[#allocation11 + $0x390] sm:$0xff] }
 0x2fb   : > { %v3553_v62 = vcombine.high %v1234_v57, %v1238_v58  ;;  %v1277_v36 = vld [vmem:[#allocation11 + $0x3b0] sm:$0xff] }
 0x2fc   : > { %v3591_v43 = vcombine.high %v1273_v35, %v1277_v36  ;;  %v1281_v47 = vld [vmem:[#allocation11 + $0x3d0] sm:$0xff] }
 0x2fd   : > { %2914 = vmatpush1.bf16.msra.mxu0 %v3494_v21  ;;  %3000 = vmatpush1.bf16.msra.mxu1 %v3496_v22  ;;  %v1242_v21 = vld [vmem:[#allocation11 + $0x298] sm:$0xff]  ;;  %v1285_v51 = vld [vmem:[#allocation11 + $0x3f0] sm:$0xff] }
 0x2fe   : > { %2915 = vmatprep.subr.bf16.mxu0 %v3503_v23  ;;  %3001 = vmatprep.subr.bf16.mxu1 %v3505_v27  ;;  %v1246_v22 = vld [vmem:[#allocation11 + $0x2b8] sm:$0xff]  ;;  %v3550_v23 = vcombine.low %v1233_v56, %v1237_v39  ;;  %v3552_v27 = vcombine.low %v1234_v57, %v1238_v58  ;;  %v3599_v56 = vcombine.high %v1281_v47, %v1285_v51  ;;  %v1289_v57 = vld [vmem:[#allocation11 + $0x410] sm:$0xff] }
 0x2ff   : > { %v3561_v29 = vcombine.high %v1242_v21, %v1246_v22  ;;  %v1293_v58 = vld [vmem:[#allocation11 + $0x430] sm:$0xff] }
 0x301   : > { %2916 = vmatpush1.bf16.msra.mxu0 %v3502_v4  ;;  %3002 = vmatpush1.bf16.msra.mxu1 %v3504_v48  ;;  %v1250_v4 = vld [vmem:[#allocation11 + $0x2d8] sm:$0xff] }
 0x302   : > { %2917 = vmatprep.subr.bf16.mxu0 %v3511_v49  ;;  %3003 = vmatprep.subr.bf16.mxu1 %v3513_v50  ;;  %v1254_v48 = vld [vmem:[#allocation11 + $0x2f8] sm:$0xff]  ;;  %v3558_v49 = vcombine.low %v1241_v63, %v1245_v2  ;;  %v3560_v50 = vcombine.low %v1242_v21, %v1246_v22  ;;  %v3607_v63 = vcombine.high %v1289_v57, %v1293_v58  ;;  %v1297_v21 = vld [vmem:[#allocation11 + $0x450] sm:$0xff] }
 0x303   : > { %v3569_v6 = vcombine.high %v1250_v4, %v1254_v48  ;;  %v1301_v22 = vld [vmem:[#allocation11 + $0x470] sm:$0xff] }
 0x305   : > { %2918 = vmatpush1.bf16.msra.mxu0 %v3510_v10  ;;  %3004 = vmatpush1.bf16.msra.mxu1 %v3512_v11  ;;  %v1258_v10 = vld [vmem:[#allocation11 + $0x318] sm:$0xff] }
 0x306   : > { %2919 = vmatprep.subr.bf16.mxu0 %v3519_v1  ;;  %3005 = vmatprep.subr.bf16.mxu1 %v3521_v15  ;;  %v1262_v11 = vld [vmem:[#allocation11 + $0x338] sm:$0xff]  ;;  %v3566_v1 = vcombine.low %v1249_v3, %v1253_v46  ;;  %v3568_v15 = vcombine.low %v1250_v4, %v1254_v48  ;;  %v3615_v3 = vcombine.high %v1297_v21, %v1301_v22  ;;  %v1305_v4 = vld [vmem:[#allocation11 + $0x490] sm:$0xff] }
 0x307   : > { %v3577_v17 = vcombine.high %v1258_v10, %v1262_v11  ;;  %v1309_v48 = vld [vmem:[#allocation11 + $0x4b0] sm:$0xff] }
 0x309   : > { %2920 = vmatpush1.bf16.msra.mxu0 %v3518_v26  ;;  %3006 = vmatpush1.bf16.msra.mxu1 %v3520_v30  ;;  %v1266_v26 = vld [vmem:[#allocation11 + $0x358] sm:$0xff] }
 0x30a   : > { %2921 = vmatprep.subr.bf16.mxu0 %v3527_v31  ;;  %3007 = vmatprep.subr.bf16.mxu1 %v3529_v32  ;;  %v1270_v30 = vld [vmem:[#allocation11 + $0x378] sm:$0xff]  ;;  %v3574_v31 = vcombine.low %v1257_v7, %v1261_v8  ;;  %v3576_v32 = vcombine.low %v1258_v10, %v1262_v11  ;;  %v3623_v7 = vcombine.high %v1305_v4, %v1309_v48  ;;  %v1313_v10 = vld [vmem:[#allocation11 + $0x4d0] sm:$0xff] }
 0x30b   : > { %v3585_v34 = vcombine.high %v1266_v26, %v1270_v30  ;;  %v1317_v11 = vld [vmem:[#allocation11 + $0x4f0] sm:$0xff] }
 0x30d   : > { %2922 = vmatpush1.bf16.msra.mxu0 %v3526_v37  ;;  %3008 = vmatpush1.bf16.msra.mxu1 %v3528_v38  ;;  %v1274_v37 = vld [vmem:[#allocation11 + $0x398] sm:$0xff] }
 0x30e   : > { %2923 = vmatprep.subr.bf16.mxu0 %v3535_v40  ;;  %3009 = vmatprep.subr.bf16.mxu1 %v3537_v42  ;;  %v1278_v38 = vld [vmem:[#allocation11 + $0x3b8] sm:$0xff]  ;;  %v3582_v40 = vcombine.low %v1265_v24, %v1269_v25  ;;  %v3584_v42 = vcombine.low %v1266_v26, %v1270_v30  ;;  %v1321_v25 = vld [vmem:[#allocation11 + $0x510] sm:$0xff] }
 0x30f   : > { %v3593_v45 = vcombine.high %v1274_v37, %v1278_v38  ;;  %v1325_v26 = vld [vmem:[#allocation11 + $0x530] sm:$0xff]  ;;  %v1326_v30 = vld [vmem:[#allocation11 + $0x538] sm:$0xff] }
 0x311   : > { %2924 = vmatpush1.bf16.msra.mxu0 %v3534_v13  ;;  %3010 = vmatpush1.bf16.msra.mxu1 %v3536_v53  ;;  %v1282_v13 = vld [vmem:[#allocation11 + $0x3d8] sm:$0xff] }
 0x312   : > { %2925 = vmatprep.subr.bf16.mxu0 %v3543_v54  ;;  %3011 = vmatprep.subr.bf16.mxu1 %v3545_v55  ;;  %v1286_v53 = vld [vmem:[#allocation11 + $0x3f8] sm:$0xff]  ;;  %v3590_v54 = vcombine.low %v1273_v35, %v1277_v36  ;;  %v3592_v55 = vcombine.low %v1274_v37, %v1278_v38  ;;  %v1329_v35 = vld [vmem:[#allocation11 + $0x550] sm:$0xff] }
 0x313   : > { %v3601_v39 = vcombine.high %v1282_v13, %v1286_v53  ;;  %v1333_v36 = vld [vmem:[#allocation11 + $0x570] sm:$0xff]  ;;  %v1330_v37 = vld [vmem:[#allocation11 + $0x558] sm:$0xff] }
 0x314   : > { %v1334_v38 = vld [vmem:[#allocation11 + $0x578] sm:$0xff] }
 0x315   : > { %2926 = vmatpush1.bf16.msra.mxu0 %v3542_v59  ;;  %3012 = vmatpush1.bf16.msra.mxu1 %v3544_v60  ;;  %v1290_v59 = vld [vmem:[#allocation11 + $0x418] sm:$0xff] }
 0x316   : > { %2927 = vmatprep.subr.bf16.mxu0 %v3551_v61  ;;  %3013 = vmatprep.subr.bf16.mxu1 %v3553_v62  ;;  %v1294_v60 = vld [vmem:[#allocation11 + $0x438] sm:$0xff]  ;;  %v3598_v61 = vcombine.low %v1281_v47, %v1285_v51  ;;  %v3600_v62 = vcombine.low %v1282_v13, %v1286_v53  ;;  %v1337_v47 = vld [vmem:[#allocation11 + $0x590] sm:$0xff] }
 0x317   : > { %v3609_v2 = vcombine.high %v1290_v59, %v1294_v60  ;;  %v1341_v51 = vld [vmem:[#allocation11 + $0x5b0] sm:$0xff]  ;;  %v1338_v13 = vld [vmem:[#allocation11 + $0x598] sm:$0xff] }
 0x318   : > { %v1342_v53 = vld [vmem:[#allocation11 + $0x5b8] sm:$0xff] }
 0x319   : > { %2928 = vmatpush1.bf16.msra.mxu0 %v3550_v23  ;;  %3014 = vmatpush1.bf16.msra.mxu1 %v3552_v27  ;;  %v1298_v23 = vld [vmem:[#allocation11 + $0x458] sm:$0xff] }
 0x31a   : > { %2929 = vmatprep.subr.bf16.mxu0 %v3559_v28  ;;  %3015 = vmatprep.subr.bf16.mxu1 %v3561_v29  ;;  %v1302_v27 = vld [vmem:[#allocation11 + $0x478] sm:$0xff]  ;;  %v3606_v28 = vcombine.low %v1289_v57, %v1293_v58  ;;  %v3608_v29 = vcombine.low %v1290_v59, %v1294_v60  ;;  %v3657_v57 = vcombine.high %v1338_v13, %v1342_v53  ;;  %v1345_v58 = vld [vmem:[#allocation11 + $0x5d0] sm:$0xff] }
 0x31b   : > { %v3617_v46 = vcombine.high %v1298_v23, %v1302_v27  ;;  %v1349_v59 = vld [vmem:[#allocation11 + $0x5f0] sm:$0xff] }
 0x31d   : > { %2930 = vmatpush1.bf16.msra.mxu0 %v3558_v49  ;;  %3016 = vmatpush1.bf16.msra.mxu1 %v3560_v50  ;;  %v1306_v49 = vld [vmem:[#allocation11 + $0x498] sm:$0xff] }
 0x31e   : > { %2931 = vmatprep.subr.bf16.mxu0 %v3567_v5  ;;  %3017 = vmatprep.subr.bf16.mxu1 %v3569_v6  ;;  %v1310_v50 = vld [vmem:[#allocation11 + $0x4b8] sm:$0xff]  ;;  %v3614_v5 = vcombine.low %v1297_v21, %v1301_v22  ;;  %v3616_v6 = vcombine.low %v1298_v23, %v1302_v27  ;;  %v3663_v21 = vcombine.high %v1345_v58, %v1349_v59  ;;  %v1353_v23 = vld [vmem:[#allocation11 + $0x610] sm:$0xff] }
 0x31f   : > { %v3625_v8 = vcombine.high %v1306_v49, %v1310_v50  ;;  %v1357_v27 = vld [vmem:[#allocation11 + $0x630] sm:$0xff] }
 0x321   : > { %2932 = vmatpush1.bf16.msra.mxu0 %v3566_v1  ;;  %3018 = vmatpush1.bf16.msra.mxu1 %v3568_v15  ;;  %v1314_v1 = vld [vmem:[#allocation11 + $0x4d8] sm:$0xff] }
 0x322   : > { %2933 = vmatprep.subr.bf16.mxu0 %v3575_v16  ;;  %3019 = vmatprep.subr.bf16.mxu1 %v3577_v17  ;;  %v1318_v15 = vld [vmem:[#allocation11 + $0x4f8] sm:$0xff]  ;;  %v3624_v16 = vcombine.low %v1306_v49, %v1310_v50  ;;  %v3631_v17 = vcombine.high %v1313_v10, %v1317_v11  ;;  %v1365_v49 = vld [vmem:[#allocation11 + $0x670] sm:$0xff] }
 0x323   : > { %v3633_v24 = vcombine.high %v1314_v1, %v1318_v15  ;;  %v1362_v50 = vld [vmem:[#allocation11 + $0x658] sm:$0xff] }
 0x325   : > { %2934 = vmatpush1.bf16.msra.mxu0 %v3574_v31  ;;  %3020 = vmatpush1.bf16.msra.mxu1 %v3576_v32  ;;  %v3630_v31 = vcombine.low %v1313_v10, %v1317_v11  ;;  %v3632_v32 = vcombine.low %v1314_v1, %v1318_v15  ;;  %v1369_v11 = vld [vmem:[#allocation11 + $0x690] sm:$0xff]  ;;  %v1370_v15 = vld [vmem:[#allocation11 + $0x698] sm:$0xff] }
 0x326   : > { %2935 = vmatprep.subr.bf16.mxu0 %v3583_v33  ;;  %3021 = vmatprep.subr.bf16.mxu1 %v3585_v34  ;;  %v3639_v33 = vcombine.high %v1321_v25, %v1325_v26  ;;  %v1373_v1 = vld [vmem:[#allocation11 + $0x6b0] sm:$0xff] }
 0x329   : > { %2936 = vmatpush1.bf16.msra.mxu0 %v3582_v40  ;;  %3022 = vmatpush1.bf16.msra.mxu1 %v3584_v42  ;;  %v3638_v40 = vcombine.low %v1321_v25, %v1325_v26  ;;  %v1377_v26 = vld [vmem:[#allocation11 + $0x6d0] sm:$0xff] }
 0x32a   : > { %2937 = vmatprep.subr.bf16.mxu0 %v3591_v43  ;;  %3023 = vmatprep.subr.bf16.mxu1 %v3593_v45  ;;  %v3647_v43 = vcombine.high %v1329_v35, %v1333_v36  ;;  %v3649_v45 = vcombine.high %v1330_v37, %v1334_v38 }
 0x32d   : > { %2938 = vmatpush1.bf16.msra.mxu0 %v3590_v54  ;;  %3024 = vmatpush1.bf16.msra.mxu1 %v3592_v55  ;;  %v3646_v54 = vcombine.low %v1329_v35, %v1333_v36  ;;  %v3648_v55 = vcombine.low %v1330_v37, %v1334_v38  ;;  %v1385_v36 = vld [vmem:[#allocation11 + $0x710] sm:$0xff]  ;;  %v1386_v38 = vld [vmem:[#allocation11 + $0x718] sm:$0xff] }
 0x32e   : > { %2939 = vmatprep.subr.bf16.mxu0 %v3599_v56  ;;  %3025 = vmatprep.subr.bf16.mxu1 %v3601_v39  ;;  %v3655_v39 = vcombine.high %v1337_v47, %v1341_v51  ;;  %v1389_v37 = vld [vmem:[#allocation11 + $0x730] sm:$0xff] }
 0x331   : > { %2940 = vmatpush1.bf16.msra.mxu0 %v3598_v61  ;;  %3026 = vmatpush1.bf16.msra.mxu1 %v3600_v62  ;;  %v1346_v61 = vld [vmem:[#allocation11 + $0x5d8] sm:$0xff] }
 0x332   : > { %2952 = vmatprep.subr.bf16.mxu0 %v3607_v63  ;;  %3038 = vmatprep.subr.bf16.mxu1 %v3609_v2  ;;  %v1350_v62 = vld [vmem:[#allocation11 + $0x5f8] sm:$0xff]  ;;  %v3654_v63 = vcombine.low %v1337_v47, %v1341_v51  ;;  %v3656_v2 = vcombine.low %v1338_v13, %v1342_v53  ;;  %v1393_v51 = vld [vmem:[#allocation11 + $0x750] sm:$0xff] }
 0x333   : > { %v3665_v22 = vcombine.high %v1346_v61, %v1350_v62  ;;  %v1397_v13 = vld [vmem:[#allocation11 + $0x770] sm:$0xff]  ;;  %v1394_v53 = vld [vmem:[#allocation11 + $0x758] sm:$0xff] }
 0x334   : > { %2942 = vmatmul.mubr.bf16.vlgmr.msra.gmra.mrb[12].mxu0 %v4769_v41  ;;  %3028 = vmatmul.mubr.bf16.vlgmr.msra.gmra.mrb[12].mxu1 %v4769_v41  ;;  %v3622_v41 = vcombine.low %v1305_v4, %v1309_v48  ;;  %v1361_v48 = vld [vmem:[#allocation11 + $0x650] sm:$0xff] }
 0x335   : > { %2953 = vmatpush1.bf16.msra.mxu0 %v3606_v28  ;;  %2984 = vmatprep.mubr.bf16.mxu0 %v4816_v52  ;;  %v1354_v28 = vld [vmem:[#allocation11 + $0x618] sm:$0xff] }
 0x336   : > { %3039 = vmatpush1.bf16.msra.mxu1 %v3608_v29  ;;  %3070 = vmatprep.mubr.bf16.mxu1 %v4816_v52  ;;  %v1322_v52 = vld [vmem:[#allocation11 + $0x518] sm:$0xff] }
 0x337   : > { %2954 = vmatprep.subr.bf16.mxu0 %v3615_v3  ;;  %3040 = vmatprep.subr.bf16.mxu1 %v3617_v46  ;;  %v3641_v34 = vcombine.high %v1322_v52, %v1326_v30  ;;  %v3640_v42 = vcombine.low %v1322_v52, %v1326_v30  ;;  %v1358_v29 = vld [vmem:[#allocation11 + $0x638] sm:$0xff]  ;;  %v3664_v3 = vcombine.low %v1346_v61, %v1350_v62  ;;  %v1381_v52 = vld [vmem:[#allocation11 + $0x6f0] sm:$0xff] }
 0x338   : > { %v3671_v46 = vcombine.high %v1353_v23, %v1357_v27  ;;  %v3673_v4 = vcombine.high %v1354_v28, %v1358_v29  ;;  %v1378_v30 = vld [vmem:[#allocation11 + $0x6d8] sm:$0xff] }
 0x339   : > { %2955 = vmatpush1.bf16.msra.mxu0 %v3614_v5  ;;  %v1366_v5 = vld [vmem:[#allocation11 + $0x678] sm:$0xff] }
 0x33a   : > { %3041 = vmatpush1.bf16.msra.mxu1 %v3616_v6  ;;  %2956 = vmatprep.subr.bf16.mxu0 %v3623_v7  ;;  %v3670_v6 = vcombine.low %v1353_v23, %v1357_v27  ;;  %v3672_v7 = vcombine.low %v1354_v28, %v1358_v29  ;;  %v3681_v10 = vcombine.high %v1362_v50, %v1366_v5  ;;  %v1402_v61 = vld [vmem:[#allocation11 + $0x798] sm:$0xff]  ;;  %v1409_v23 = vld [vmem:[#allocation11 + $0x7d0] sm:$0xff] }
 0x33b   : > { %3042 = vmatprep.subr.bf16.mxu1 %v3625_v8  ;;  %v3679_v8 = vcombine.high %v1361_v48, %v1365_v49  ;;  %v1406_v62 = vld [vmem:[#allocation11 + $0x7b8] sm:$0xff]  ;;  %v1413_v27 = vld [vmem:[#allocation11 + $0x7f0] sm:$0xff] }
 0x33c   : > { %v1410_v28 = vld [vmem:[#allocation11 + $0x7d8] sm:$0xff] }
 0x33d   : > { %2957 = vmatpush1.bf16.msra.mxu0 %v3622_v41  ;;  %v1374_v41 = vld [vmem:[#allocation11 + $0x6b8] sm:$0xff] }
 0x33e   : > { %3043 = vmatpush1.bf16.msra.mxu1 %v3624_v16  ;;  %2958 = vmatprep.subr.bf16.mxu0 %v3631_v17  ;;  %v3678_v16 = vcombine.low %v1361_v48, %v1365_v49  ;;  %v3680_v17 = vcombine.low %v1362_v50, %v1366_v5  ;;  %v3689_v25 = vcombine.high %v1370_v15, %v1374_v41  ;;  %v1414_v29 = vld [vmem:[#allocation11 + $0x7f8] sm:$0xff]  ;;  %v1415_v50 = vld [vmem:[%s4974_s4] sm:$0xff] }
 0x33f   : > { %3044 = vmatprep.subr.bf16.mxu1 %v3633_v24  ;;  %v3687_v24 = vcombine.high %v1369_v11, %v1373_v1  ;;  %v3726_v48 = vcombine.low %v1409_v23, %v1413_v27  ;;  %v3728_v49 = vcombine.low %v1410_v28, %v1414_v29  ;;  %v1420_v5 = vrot.slane %v1415_v50, %v4755_v12 }
 0x341   : > { %2959 = vmatpush1.bf16.msra.mxu0 %v3630_v31  ;;  %v1382_v31 = vld [vmem:[#allocation11 + $0x6f8] sm:$0xff] }
 0x342   : > { %3045 = vmatpush1.bf16.msra.mxu1 %v3632_v32  ;;  %2960 = vmatprep.subr.bf16.mxu0 %v3639_v33  ;;  %v3686_v32 = vcombine.low %v1369_v11, %v1373_v1  ;;  %v3688_v33 = vcombine.low %v1370_v15, %v1374_v41  ;;  %v3697_v35 = vcombine.high %v1378_v30, %v1382_v31 }
 0x343   : > { %3046 = vmatprep.subr.bf16.mxu1 %v3641_v34  ;;  %v3695_v34 = vcombine.high %v1377_v26, %v1381_v52 }
 0x345   : > { %2961 = vmatpush1.bf16.msra.mxu0 %v3638_v40  ;;  %v1390_v40 = vld [vmem:[#allocation11 + $0x738] sm:$0xff] }
 0x346   : > { %3047 = vmatpush1.bf16.msra.mxu1 %v3640_v42  ;;  %2962 = vmatprep.subr.bf16.mxu0 %v3647_v43  ;;  %v3694_v42 = vcombine.low %v1377_v26, %v1381_v52  ;;  %v3696_v43 = vcombine.low %v1378_v30, %v1382_v31  ;;  %v3705_v47 = vcombine.high %v1386_v38, %v1390_v40 }
 0x347   : > { %3048 = vmatprep.subr.bf16.mxu1 %v3649_v45  ;;  %v831_v56 = vpop.permute.xlu0 %830  ;;  %v3703_v45 = vcombine.high %v1385_v36, %v1389_v37 }
 0x348   : > { %v4835_v60 = vmax.bf16 %v831_v56, %v4802_v18  ;;  %v3662_v18 = vcombine.low %v1345_v58, %v1349_v59  ;;  %v3704_v56 = vcombine.low %v1386_v38, %v1390_v40  ;;  %v1401_v58 = vld [vmem:[#allocation11 + $0x790] sm:$0xff] }
 0x349   : > { %2963 = vmatpush1.bf16.msra.mxu0 %v3646_v54  ;;  %v1398_v54 = vld [vmem:[#allocation11 + $0x778] sm:$0xff]  ;;  %v1405_v59 = vld [vmem:[#allocation11 + $0x7b0] sm:$0xff] }
 0x34a   : > { %3049 = vmatpush1.bf16.msra.mxu1 %v3648_v55  ;;  %835 = vrot.lane.b32.xlu1 %v4835_v60, %s4347_s23  ;;  %v3702_v55 = vcombine.low %v1385_v36, %v1389_v37  ;;  %s4250_s23 = scalar_lea.vmem %s4249_s29, 256 }
 0x34b   : > { %2964 = vmatprep.subr.bf16.mxu0 %v3655_v39  ;;  %3050 = vmatprep.subr.bf16.mxu1 %v3657_v57  ;;  %v3711_v39 = vcombine.high %v1393_v51, %v1397_v13  ;;  %v3713_v57 = vcombine.high %v1394_v53, %v1398_v54  ;;  %p4252_p4 = scmp.lt.s32.totalorder %s4250_s23, %s4244_s3 }
 0x34d   : > { %2965 = vmatpush1.bf16.msra.mxu0 %v3654_v63  ;;  %v3710_v63 = vcombine.low %v1393_v51, %v1397_v13  ;;  %v1439_v51 = vsub.s32 5, %v4752_v9  ;;  %v1447_v13 = vsub.s32 7, %v4752_v9  ;;  %p4253_p6 = por %p4252_p4, %p4251_p0 }
 0x34e   : > { %3051 = vmatpush1.bf16.msra.mxu1 %v3656_v2  ;;  %2966 = vmatprep.subr.bf16.mxu0 %v3663_v21  ;;  %v3712_v2 = vcombine.low %v1394_v53, %v1398_v54  ;;  %v3719_v21 = vcombine.high %v1401_v58, %v1405_v59 }
 0x34f   : > { %3052 = vmatprep.subr.bf16.mxu1 %v3665_v22  ;;  %v3721_v22 = vcombine.high %v1402_v61, %v1406_v62  ;;  %p4254_p7 = pnand %p4253_p6, %p4247_p8 }
 0x351   : > { %2967 = vmatpush1.bf16.msra.mxu0 %v3662_v18  ;;  %v3718_v18 = vcombine.low %v1401_v58, %v1405_v59 }
 0x352   : > { %3053 = vmatpush1.bf16.msra.mxu1 %v3664_v3  ;;  %2968 = vmatprep.subr.bf16.mxu0 %v3671_v46  ;;  %v3720_v3 = vcombine.low %v1402_v61, %v1406_v62  ;;  %v3727_v46 = vcombine.high %v1409_v23, %v1413_v27 }
 0x353   : > { %3054 = vmatprep.subr.bf16.mxu1 %v3673_v4  ;;  %v3729_v4 = vcombine.high %v1410_v28, %v1414_v29 }
 0x355   : > { %2969 = vmatpush1.bf16.msra.mxu0 %v3670_v6  ;;  %v1428_v6 = vrot.slane %v1415_v50, %v885_v19 }
 0x356   : > { %3055 = vmatpush1.bf16.msra.mxu1 %v3672_v7  ;;  %2970 = vmatprep.subr.bf16.mxu0 %v3679_v8  ;;  %v1424_v7 = vrot.slane %v1415_v50, %v4763_v14  ;;  %v1432_v8 = vrot.slane %v1415_v50, %v889_v20 }
 0x357   : > { %3056 = vmatprep.subr.bf16.mxu1 %v3681_v10 }
 0x359   : > { %2971 = vmatpush1.bf16.msra.mxu0 %v3678_v16 }
 0x35a   : > { %3057 = vmatpush1.bf16.msra.mxu1 %v3680_v17  ;;  %2972 = vmatprep.subr.bf16.mxu0 %v3687_v24 }
 0x35b   : > { %3058 = vmatprep.subr.bf16.mxu1 %v3689_v25 }
 0x35d   : > { %2973 = vmatpush1.bf16.msra.mxu0 %v3686_v32 }
 0x35e   : > { %3059 = vmatpush1.bf16.msra.mxu1 %v3688_v33  ;;  %2974 = vmatprep.subr.bf16.mxu0 %v3695_v34 }
 0x35f   : > { %3060 = vmatprep.subr.bf16.mxu1 %v3697_v35 }
 0x361   : > { %2975 = vmatpush1.bf16.msra.mxu0 %v3694_v42 }
 0x362   : > { %3061 = vmatpush1.bf16.msra.mxu1 %v3696_v43  ;;  %2976 = vmatprep.subr.bf16.mxu0 %v3703_v45  ;;  %v1435_v45 = vsub.s32 4, %v4752_v9 }
 0x363   : > { %3062 = vmatprep.subr.bf16.mxu1 %v3705_v47  ;;  %v1443_v47 = vsub.s32 6, %v4752_v9 }
 0x364   : > { %v1436_v53 = vrot.slane %v1415_v50, %v1435_v45 }
 0x365   : > { %2977 = vmatpush1.bf16.msra.mxu0 %v3702_v55  ;;  %v1444_v54 = vrot.slane %v1415_v50, %v1443_v47  ;;  %v1440_v55 = vrot.slane %v1415_v50, %v1439_v51 }
 0x366   : > { %3063 = vmatpush1.bf16.msra.mxu1 %v3704_v56  ;;  %2978 = vmatprep.subr.bf16.mxu0 %v3711_v39  ;;  %v1448_v56 = vrot.slane %v1415_v50, %v1447_v13 }
 0x367   : > { %3064 = vmatprep.subr.bf16.mxu1 %v3713_v57 }
 0x369   : > { %2979 = vmatpush1.bf16.msra.mxu0 %v3710_v63 }
 0x36a   : > { %3065 = vmatpush1.bf16.msra.mxu1 %v3712_v2  ;;  %2980 = vmatprep.subr.bf16.mxu0 %v3719_v21 }
 0x36b   : > { %3066 = vmatprep.subr.bf16.mxu1 %v3721_v22 }
 0x36d   : > { %2981 = vmatpush1.bf16.msra.mxu0 %v3718_v18 }
 0x36e   : > { %3067 = vmatpush1.bf16.msra.mxu1 %v3720_v3  ;;  %2982 = vmatprep.subr.bf16.mxu0 %v3727_v46 }
 0x36f   : > { %3068 = vmatprep.subr.bf16.mxu1 %v3729_v4 }
 0x371   : > { %2983 = vmatpush1.bf16.msra.mxu0 %v3726_v48 }
 0x372   : > { %3069 = vmatpush1.bf16.msra.mxu1 %v3728_v49  ;;  %3791 = vmatprep.subr.bf16.mxu0 %v4343_v0 }
 0x374   : > { %2985 = vmatmul.mubr.bf16.vlgmr.msra.gmra.mrb[12].mxu0 %v4814_v44 }
 0x375   : > { %3071 = vmatmul.mubr.bf16.vlgmr.msra.gmra.mrb[12].mxu1 %v4814_v44  ;;  %3803 = vmatprep.mubr.msk.bf16.mxu0 %vm4344_vm0, %v4343_v0 }
 0x3c7   : > { %v2814_v10 = vpop.f32.mrb[8].mxu0  ;;  %v2900_v11 = vpop.f32.mrb[8].mxu1 }
 0x3c8   : > { %v3807_v44 = vadd.f32 %v2814_v10, %v1420_v5  ;;  %v3811_v1 = vadd.f32 %v2900_v11, %v1428_v6  ;;  %v2816_v15 = vpop.f32.mrb[9].mxu0  ;;  %v2902_v41 = vpop.f32.mrb[9].mxu1 }
 0x3c9   : > { %v3808_v16 = vadd.f32 %v2816_v15, %v1424_v7  ;;  %v3812_v17 = vadd.f32 %v2902_v41, %v1432_v8  ;;  %v2818_v24 = vpop.f32.mrb[10].mxu0  ;;  %v2904_v25 = vpop.f32.mrb[10].mxu1 }
 0x3ca   : > { %v3809_v26 = vadd.f32 %v2818_v24, %v1420_v5  ;;  %v3813_v12 = vadd.f32 %v2904_v25, %v1428_v6  ;;  %v2820_v52 = vpop.f32.mrb[11].mxu0  ;;  %v2906_v30 = vpop.f32.mrb[11].mxu1  ;;  %v3081_v14 = vmax.f32 %v3807_v44, 0.0  ;;  %v3083_v32 = vmax.f32 %v3811_v1, 0.0  ;;  %v4038_v5 = vld [vmem:[#allocation13] sm:$0xff]   ;;  %v4039_v44 = vld [vmem:[#allocation13 + $0x8] sm:$0xff]  }
 0x3cb   : > { %v3810_v19 = vadd.f32 %v2820_v52, %v1424_v7  ;;  %v3814_v31 = vadd.f32 %v2906_v30, %v1432_v8  ;;  %v3082_v34 = vmax.f32 %v3808_v16, 0.0  ;;  %v3084_v35 = vmax.f32 %v3812_v17, 0.0  ;;  %3792 = vmatpush3.bf16.msra.mxu0 %v4038_v5  ;;  %v4040_v25 = vld [vmem:[#allocation13 + $0x10] sm:$0xff]   ;;  %v4041_v52 = vld [vmem:[#allocation13 + $0x18] sm:$0xff]   ;;  %v4042_v30 = vld [vmem:[#allocation13 + $0x20] sm:$0xff]  }
 0x3cc   : > { %v3089_v33 = vmax.f32 %v3809_v26, 0.0  ;;  %v3091_v20 = vmax.f32 %v3813_v12, 0.0  ;;  %3793 = vmatprep.subr.bf16.mxu0 %v4343_v0 }
 0x3cd   : > { %v3090_v36 = vmax.f32 %v3810_v19, 0.0  ;;  %v3092_v37 = vmax.f32 %v3814_v31, 0.0  ;;  %v4043_v19 = vld [vmem:[#allocation13 + $0x28] sm:$0xff]  }
 0x3ce   : > { %v3097_v38 = vpack.c.bf16 %v3089_v33, %v3081_v14  ;;  %v3099_v40 = vpack.c.bf16 %v3091_v20, %v3083_v32  ;;  %v836_v32 = vpop.permute.xlu1 %835 }
 0x3cf   : > { %v3098_v42 = vpack.c.bf16 %v3090_v36, %v3082_v34  ;;  %v3100_v43 = vpack.c.bf16 %v3092_v37, %v3084_v35  ;;  %3794 = vmatpush3.bf16.msra.mxu0 %v4039_v44  ;;  %v838_v33 = vmax.bf16 %v836_v32, %v4835_v60  ;;  %v3730_v35 = vld [vmem:[%s4975_s28] ss:$0 sm:$0xff] }
 0x3d0   : > { %3795 = vmatprep.subr.bf16.mxu0 %v4343_v0 }
 0x3d3   : > { %3796 = vmatpush3.bf16.msra.mxu0 %v4040_v25 }
 0x3d4   : > { %3797 = vmatprep.subr.bf16.mxu0 %v4343_v0 }
 0x3d7   : > { %3798 = vmatpush3.bf16.msra.mxu0 %v4041_v52 }
 0x3d8   : > { %3799 = vmatprep.subr.bf16.mxu0 %v4343_v0 }
 0x3db   : > { %3800 = vmatpush3.bf16.msra.mxu0 %v4042_v30 }
 0x3dc   : > { %3801 = vmatprep.subr.bf16.mxu0 %v4343_v0 }
 0x3df   : > { %3802 = vmatpush3.bf16.msra.mxu0 %v4043_v19 }
 0x447   : > { %v2986_v39 = vpop.f32.mrb[12].mxu0 }
 0x448   : > { %v3815_v57 = vadd.f32 %v2986_v39, %v1436_v53  ;;  %v3072_v58 = vpop.f32.mrb[12].mxu1  ;;  %v2988_v59 = vpop.f32.mrb[13].mxu0 }
 0x449   : > { %v3819_v61 = vadd.f32 %v3072_v58, %v1444_v54  ;;  %v3816_v62 = vadd.f32 %v2988_v59, %v1440_v55  ;;  %v3074_v63 = vpop.f32.mrb[13].mxu1  ;;  %v2990_v2 = vpop.f32.mrb[14].mxu0 }
 0x44a   : > { %v3820_v21 = vadd.f32 %v3074_v63, %v1448_v56  ;;  %v3817_v22 = vadd.f32 %v2990_v2, %v1436_v53  ;;  %v3076_v23 = vpop.f32.mrb[14].mxu1  ;;  %v2992_v27 = vpop.f32.mrb[15].mxu0  ;;  %v3085_v9 = vmax.f32 %v3815_v57, 0.0 }
 0x44b   : > { %v3821_v28 = vadd.f32 %v3076_v23, %v1444_v54  ;;  %v3818_v29 = vadd.f32 %v2992_v27, %v1440_v55  ;;  %v3078_v18 = vpop.f32.mrb[15].mxu1  ;;  %v3087_v4 = vmax.f32 %v3819_v61, 0.0  ;;  %v3086_v48 = vmax.f32 %v3816_v62, 0.0 }
 0x44c   : > { %v3093_v3 = vmax.f32 %v3817_v22, 0.0  ;;  %v3822_v46 = vadd.f32 %v3078_v18, %v1448_v56  ;;  %v3088_v6 = vmax.f32 %v3820_v21, 0.0 }
 0x44d   : > { %v3095_v49 = vmax.f32 %v3821_v28, 0.0  ;;  %v3094_v50 = vmax.f32 %v3818_v29, 0.0 }
 0x44e   : > { %v3101_v7 = vpack.c.bf16 %v3093_v3, %v3085_v9  ;;  %v3096_v8 = vmax.f32 %v3822_v46, 0.0 }
 0x44f   : > { %v3103_v10 = vpack.c.bf16 %v3095_v49, %v3087_v4  ;;  %v3102_v11 = vpack.c.bf16 %v3094_v50, %v3086_v48 }
 0x450   : > { %v3105_v1 = vmax.bf16 %v3101_v7, %v3097_v38  ;;  %v3104_v15 = vpack.c.bf16 %v3096_v8, %v3088_v6 }
 0x451   : > { %v3107_v41 = vmax.bf16 %v3103_v10, %v3099_v40  ;;  %v3106_v16 = vmax.bf16 %v3102_v11, %v3098_v42 }
 0x452   : > { %v3108_v17 = vmax.bf16 %v3104_v15, %v3100_v43 }
 0x453   : > { %v3109_v24 = vmax.bf16 %v3107_v41, %v3105_v1 }
 0x454   : > { %v3110_v26 = vmax.bf16 %v3108_v17, %v3106_v16 }
 0x456   : > { %v3111_v12 = vmax.bf16 %v3110_v26, %v3109_v24 }
 0x458   : > { %3113 = vrot.lane.b32.xlu0 %v3111_v12, %s4346_s8 }
 0x4ca   : > { %v3114_v31 = vpop.permute.xlu0 %3113 }
 0x4cb   : > { %v3116_v14 = vmax.bf16 %v3114_v31, %v3111_v12 }
 0x4cd   : > { %3118 = vrot.lane.b32.xlu1 %v3116_v14, %s4348_s18 }
 0x53f   : > { %v3119_v20 = vpop.permute.xlu1 %3118 }
 0x540   : > { %v3123_v34 = vsel %vm3120_vm1, %v838_v33, %v3119_v20 }
 0x541   : > { %3804 = vmatmul.mubr.msk.bf16.vlgmr.msra.gmra.mrb[16].mxu0 %vm3179_vm2, %v3123_v34 }
 0x614   : > { %v3216_v0 = vpop.f32.mrb[16].mxu0 }
 0x615   : > { %v3217_v36 = vadd.f32 %v3730_v35, %v3216_v0  ;;  %v3805_v37 = vpop.f32.mrb[17].mxu0 }
 0x616   : > { %v3219_v38 = vpop.f32.mrb[18].mxu0 }
 0x617   : > { %v3220_v40 = vadd.f32 %v3730_v35, %v3219_v38  ;;  %v3806_v42 = vpop.f32.mrb[19].mxu0  ;;  %v3223_v60 = vmax.f32 %v3217_v36, 0.0 }
 0x619   : > { %v3224_v43 = vmax.f32 %v3220_v40, 0.0 }
 0x61b   : > { %v3753_v45 = vpack.c.bf16 %v3224_v43, %v3223_v60 }
 0x61d   : > { %3754 = vst [vmem:[%s543_s30] sm:$0xff] %v3753_v45  }
 0x61e   : > { %4257 = shalt.err (!%p4254_p7)
}
 0x61f   : > { %s4258_s9 = scalar_lea.hbm %s4873_s13, 128  ;;  %s4262_s18 = scalar_lea.hbm %s4976_s16, 512 }
 0x620   : > { %p4259_p9 = scmp.ne.s32.totalorder %s4873_s13, %s4258_s9  ;;  %p4263_p1 = scmp.lt.u32.totalorder %s4873_s13, %s4976_s16 }
 0x621   : > { %p4264_p11 = scmp.lt.u32.totalorder %s4262_s18, %s4258_s9  ;;  %p4266_p2 = scmp.lt.u32.totalorder %s4258_s9, %s4873_s13 }
 0x622   : > { %p4260_p3 = pnand %p4259_p9, %p4977_p13 }
 0x623   : > { %p4265_p12 = por %p4264_p11, %p4263_p1 }
 0x624   : > { %p4261_p10 = pneg %p4260_p3 }
 0x625   : > { %p4267_p5 = por %p4266_p2, %p4265_p12 }
 0x627   : > { %p4268_p8 = pnand %p4267_p5, %p4261_p10 }
 0x629   : > { %4271 = shalt.err (!%p4268_p8)
}
 0x62a   : > { %s4350_s28 = smov 4  }
 0x62b   : > { %3863 = dma.vmem_to_hbm [thread:$0]  (%p4977_p13), %s4868_s11, 128, %s4873_s13, %s3236_s1, %s4346_s8, %s4346_s8, %s4350_s28  }
 0x62c PF: > { %p3903_p0 = scmp.ge.s32.totalorder %s4326_s24, 2  ;;  %s3264_s30 = sand.u32 1, %s4314_s21  }
 0x62d   : > { %p4978_p4 = scmp.ne.s32.totalorder %s4964_s26, 0  ;;  %s3265_s14 = scalar_lea.sflag [#allocation4], %s3264_s30 }
 0x62f   : > { %p3889_p6 = pnand %p3903_p0, %p4978_p4 }
 0x631   : > { %4309 = dma.done.wait (!%p3889_p6), %s3265_s14, 128  }
 0x632   : > { %4311 = vsyncadd (!%p3889_p6), %s3265_s14, 4294967168  ;;  %s4979_s12 = sld [smem:[#allocation21_spill]]  ;;  %s4980_s23 = sld [smem:[#allocation22_spill]] }
 0x633   : > { %p30_p7 = scmp.ge.s32.totalorder %s4575_s25, 6   ;;  %s4981_s21 = smov %s4318_s22 }
 0x634   : > { %s4983_s24 = smov %s4575_s25 }
 0x635   :  { %32 = sbr.rel (!%p30_p7) target bundleno = 19 (0x13), region = 146 }
 0x638   : > { %s4982_s22 = smov %s4979_s12 }
 0x63c   :  { %3270 = vsyncpa [#allocation3], 1 }
 0x63d   :  { %3272 = vsyncpa [#allocation3 + $0x1], 1 }
 0x63e   :  { %3273 = vsyncpa [#allocation6], 1 }
 0x63f   :  { %3274 = vsyncpa [#allocation9], 1 }
 0x640   :  { %3276 = vsyncpa [#allocation9 + $0x1], 1 }
 0x641   :  { %3277 = vsyncpa [#allocation12], 1 }
 0x642   :  { %3278 = vsyncpa [#allocation4], 1 }
 0x643   :  { %3280 = vsyncpa [#allocation4 + $0x1], 1 }

</bundles_post_ra>
